<compile_context>
chip_gen: v7x
topology: tpu7x:2x2x1
jax: 0.10.0
libtpu: 0.0.40
codegen_flags: <defaults>
</compile_context>

<pallas_src>
import functools
import math

import jax
import jax.numpy as jnp
from jax import lax
from jax.experimental import pallas as pl
from jax.experimental.pallas import tpu as pltpu


# ---------------------------------------------------------------------------
# Fused MHA kernel: one grid step == one batch element, all heads.
# ---------------------------------------------------------------------------
def _mha_fused_kernel(q_ref, k_ref, v_ref, *rest, h, d_k, has_mask):
    if has_mask:
        (m_ref, wq_ref, wk_ref, wv_ref, bq_ref, bk_ref, bv_ref,
         wo_ref, bo_ref, o_ref, ctx_ref) = rest
    else:
        (wq_ref, wk_ref, wv_ref, bq_ref, bk_ref, bv_ref,
         wo_ref, bo_ref, o_ref, ctx_ref) = rest
        m_ref = None

    xq = q_ref[0]                         # (S, D) f32
    xk = k_ref[0]
    xv = v_ref[0]
    S, D = xq.shape
    mxu_dtype = wq_ref.dtype              # f32 or bf16 (set by the wrapper)
    scale = 1.0 / math.sqrt(d_k)

    # Full-width projections: one (S,D)x(D,D) MXU matmul each, f32 accumulate,
    # bias added in f32 on the VPU.
    q_full = jnp.dot(xq.astype(mxu_dtype), wq_ref[...],
                     preferred_element_type=jnp.float32) + bq_ref[...]
    k_full = jnp.dot(xk.astype(mxu_dtype), wk_ref[...],
                     preferred_element_type=jnp.float32) + bk_ref[...]
    v_full = jnp.dot(xv.astype(mxu_dtype), wv_ref[...],
                     preferred_element_type=jnp.float32) + bv_ref[...]

    if has_mask:
        # Hoisted once per grid step (not once per head).  Additive bias form:
        # identical to masked_fill after softmax except for the degenerate
        # fully-masked-row case (torch gives a uniform row there).
        mask_bias = jnp.where(m_ref[0].astype(jnp.float32) == 0.0,
                              jnp.float32(-1000000000.0), jnp.float32(0.0))

    # Per-head attention.  h is small and static; each head's intermediates
    # die at the ctx_ref store, so live ranges stay bounded.
    for head in range(h):
        lo = head * d_k
        q_h = q_full[:, lo:lo + d_k]
        k_h = k_full[:, lo:lo + d_k]
        v_h = v_full[:, lo:lo + d_k]

        # scores = q_h @ k_h^T / sqrt(d_k): contract the lane dims of both
        # operands on the MXU (no explicit transpose of k_h in the kernel).
        s = lax.dot_general(q_h.astype(mxu_dtype), k_h.astype(mxu_dtype),
                            (((1,), (1,)), ((), ())),
                            preferred_element_type=jnp.float32) * scale
        if has_mask:
            s = s + mask_bias

        # Numerically-stable softmax, exact divide (parity with the reference).
        s = s - jnp.max(s, axis=-1, keepdims=True)
        p = jnp.exp(s)
        p = p / jnp.sum(p, axis=-1, keepdims=True)

        # ctx_h written at its static lane offset into the (S, D) VMEM slab.
        ctx_ref[:, lo:lo + d_k] = jnp.dot(p.astype(mxu_dtype),
                                          v_h.astype(mxu_dtype),
                                          preferred_element_type=jnp.float32)

    # One full-depth output projection: concat_h(ctx_h) @ Wo + bo.
    o_ref[0] = (jnp.dot(ctx_ref[...].astype(mxu_dtype), wo_ref[...],
                        preferred_element_type=jnp.float32)
                + bo_ref[...]).astype(o_ref.dtype)


def mha_forward(q, k, v, mask, wq, wk, wv, bq, bk, bv, wo, bo, *, h, d_k):
    """q/k/v: (B, S, D) f32; mask: (B, S, S) int8 (0 => masked) or None."""
    B, S, D = q.shape
    has_mask = mask is not None
    kernel = functools.partial(_mha_fused_kernel, h=h, d_k=d_k, has_mask=has_mask)

    x_spec = pl.BlockSpec((1, S, D), lambda b: (b, 0, 0))
    w_spec = pl.BlockSpec((D, D), lambda b: (0, 0))       # resident weights
    b_spec = pl.BlockSpec((1, D), lambda b: (0, 0))       # resident biases

    in_specs = [x_spec, x_spec, x_spec]
    args = [q, k, v]
    if has_mask:
        in_specs.append(pl.BlockSpec((1, S, S), lambda b: (b, 0, 0)))
        args.append(mask)
    in_specs += [w_spec, w_spec, w_spec, b_spec, b_spec, b_spec, w_spec, b_spec]
    args += [wq, wk, wv, bq, bk, bv, wo, bo]

    return pl.pallas_call(
        kernel,
        out_shape=jax.ShapeDtypeStruct((B, S, D), q.dtype),
        grid=(B,),
        in_specs=in_specs,
        out_specs=pl.BlockSpec((1, S, D), lambda b: (b, 0, 0)),
        scratch_shapes=[pltpu.VMEM((S, D), jnp.float32)],   # per-batch ctx slab
        compiler_params=pltpu.CompilerParams(
            dimension_semantics=("parallel",),               # feeds both TCs on v7x
            vmem_limit_bytes=32 * 1024 * 1024),
    )(*args)


# ---------------------------------------------------------------------------
# Module wrapper (parameter setup; optional bf16 weight storage for the MXU)
# ---------------------------------------------------------------------------
class MultiHeadedAttentionPallas:
    def __init__(self, h, d_model, key, mxu_dtype=jnp.float32):
        assert d_model % h == 0
        self.h = h
        self.d_k = d_model // h
        self.d_model = d_model

        # 4 Linear(d_model, d_model), PyTorch-style uniform init, stored (in, out).
        bound = 1.0 / math.sqrt(d_model)
        keys = jax.random.split(key, 8)
        self.weights, self.biases = [], []
        for i in range(4):
            w = jax.random.uniform(keys[2 * i], (d_model, d_model), jnp.float32, -bound, bound)
            b = jax.random.uniform(keys[2 * i + 1], (d_model,), jnp.float32, -bound, bound)
            self.weights.append(w)
            self.biases.append(b)

        # Kernel-facing copies: weights in the MXU operand dtype (bf16 halves
        # weight HBM/VMEM traffic on v6e/v7x), biases kept f32 (VPU add).
        self.wq = self.weights[0].astype(mxu_dtype)
        self.wk = self.weights[1].astype(mxu_dtype)
        self.wv = self.weights[2].astype(mxu_dtype)
        self.wo = self.weights[3].astype(mxu_dtype)
        self.bq = self.biases[0].reshape(1, d_model)
        self.bk = self.biases[1].reshape(1, d_model)
        self.bv = self.biases[2].reshape(1, d_model)
        self.bo = self.biases[3].reshape(1, d_model)

    def __call__(self, query, key, value, mask=None):
        B, S, D = query.shape
        if mask is None:
            mask_arr = None                                   # no mask DMA at all
        else:
            # int8 0/1 mask: 4x less HBM traffic than f32.
            mask_arr = (jnp.broadcast_to(mask, (B, S, S)) != 0).astype(jnp.int8)
        return mha_forward(query, key, value, mask_arr,
                           self.wq, self.wk, self.wv,
                           self.bq, self.bk, self.bv,
                           self.wo, self.bo,
                           h=self.h, d_k=self.d_k)


# ---------------------------------------------------------------------------
# Pure-JAX reference (mirrors the PyTorch module, eval mode)
# ---------------------------------------------------------------------------
def _reference(mha, query, key, value, mask=None):
    B, S, D = query.shape
    h, d_k = mha.h, mha.d_k

    def lin(x, i):
        return x @ mha.weights[i] + mha.biases[i]

    q = lin(query, 0).reshape(B, S, h, d_k).transpose(0, 2, 1, 3)
    k = lin(key, 1).reshape(B, S, h, d_k).transpose(0, 2, 1, 3)
    v = lin(value, 2).reshape(B, S, h, d_k).transpose(0, 2, 1, 3)
    scores = jnp.einsum("bhqd,bhkd->bhqk", q, k) / math.sqrt(d_k)
    if mask is not None:
        scores = jnp.where(mask[:, None] == 0, -1000000000.0, scores)
    p = jax.nn.softmax(scores, axis=-1)
    x = jnp.einsum("bhqk,bhkd->bhqd", p, v)
    x = x.transpose(0, 2, 1, 3).reshape(B, S, h * d_k)
    return lin(x, 3)


# ---------------------------------------------------------------------------
if __name__ == "__main__":
    # d_model=128 so the per-batch output slab is lane-dense (>=128 lanes) and
    # the full-width projections are real MXU-width matmuls.
    B, S, H, D_MODEL = 2, 16, 4, 128

    root = jax.random.PRNGKey(0)
    k_params, k_q, k_k, k_v, k_m = jax.random.split(root, 5)

    query = jax.random.normal(k_q, (B, S, D_MODEL), jnp.float32)
    key = jax.random.normal(k_k, (B, S, D_MODEL), jnp.float32)
    value = jax.random.normal(k_v, (B, S, D_MODEL), jnp.float32)
    mask = (jax.random.uniform(k_m, (B, S, S)) > 0.2).astype(jnp.float32)

    # --- f32 MXU-operand path (tight parity with the reference) -------------
    mha = MultiHeadedAttentionPallas(H, D_MODEL, k_params)
    out = jax.block_until_ready(mha(query, key, value, mask=mask))
    assert out.shape == (B, S, D_MODEL)

    ref = _reference(mha, query, key, value, mask=mask)
    # Tolerance covers XLA's default (bf16-pass) f32 matmul precision used by
    # BOTH the kernel and the reference on TPU, not extra kernel error.
    assert jnp.allclose(out, ref, atol=1e-2, rtol=1e-2), float(jnp.max(jnp.abs(out - ref)))

    out_nm = jax.block_until_ready(mha(query, key, value))          # mask=None path (no mask DMA)
    ref_nm = _reference(mha, query, key, value, mask=None)
    assert jnp.allclose(out_nm, ref_nm, atol=1e-2, rtol=1e-2)

    # --- bf16 MXU-operand path (v5e/v6e/v7x fast path, f32 accumulation) ----
    mha_bf16 = MultiHeadedAttentionPallas(H, D_MODEL, k_params, mxu_dtype=jnp.bfloat16)
    out_bf16 = jax.block_until_ready(mha_bf16(query, key, value, mask=mask))
    assert jnp.allclose(out_bf16, ref, atol=5e-2, rtol=5e-2), \
        float(jnp.max(jnp.abs(out_bf16 - ref)))

    print("KERNEL_OK")
</pallas_src>

<mosaic_0001>
module attributes {stable_mosaic.version = 11 : i64} {
  func.func @_mha_fused_kernel(%arg0: i32, %arg1: memref<1x16x128xf32, #tpu.memory_space<vmem>>, %arg2: memref<1x16x128xf32, #tpu.memory_space<vmem>>, %arg3: memref<1x16x128xf32, #tpu.memory_space<vmem>>, %arg4: memref<1x16x16xi8, #tpu.memory_space<vmem>>, %arg5: memref<128x128xf32, #tpu.memory_space<vmem>>, %arg6: memref<128x128xf32, #tpu.memory_space<vmem>>, %arg7: memref<128x128xf32, #tpu.memory_space<vmem>>, %arg8: memref<1x128xf32, #tpu.memory_space<vmem>>, %arg9: memref<1x128xf32, #tpu.memory_space<vmem>>, %arg10: memref<1x128xf32, #tpu.memory_space<vmem>>, %arg11: memref<128x128xf32, #tpu.memory_space<vmem>>, %arg12: memref<1x128xf32, #tpu.memory_space<vmem>>, %arg13: memref<1x16x128xf32, #tpu.memory_space<vmem>>, %arg14: memref<16x128xf32, #tpu.memory_space<vmem>>) attributes {dimension_semantics = [#tpu.dimension_semantics<parallel>], iteration_bounds = array<i64: 2>, scalar_prefetch = 0 : i64, scratch_operands = 1 : i64, tpu.core_type = #tpu.core_type<tc>, window_params = [{transform_indices = @transform_0, window_bounds = array<i64: 1, 16, 128>}, {transform_indices = @transform_1, window_bounds = array<i64: 1, 16, 128>}, {transform_indices = @transform_2, window_bounds = array<i64: 1, 16, 128>}, {transform_indices = @transform_3, window_bounds = array<i64: 1, 16, 16>}, {pipeline_mode = #tpu.pipeline_mode<synchronous>, transform_indices = @transform_4, window_bounds = array<i64: 128, 128>}, {pipeline_mode = #tpu.pipeline_mode<synchronous>, transform_indices = @transform_5, window_bounds = array<i64: 128, 128>}, {pipeline_mode = #tpu.pipeline_mode<synchronous>, transform_indices = @transform_6, window_bounds = array<i64: 128, 128>}, {pipeline_mode = #tpu.pipeline_mode<synchronous>, transform_indices = @transform_7, window_bounds = array<i64: 1, 128>}, {pipeline_mode = #tpu.pipeline_mode<synchronous>, transform_indices = @transform_8, window_bounds = array<i64: 1, 128>}, {pipeline_mode = #tpu.pipeline_mode<synchronous>, transform_indices = @transform_9, window_bounds = array<i64: 1, 128>}, {pipeline_mode = #tpu.pipeline_mode<synchronous>, transform_indices = @transform_10, window_bounds = array<i64: 128, 128>}, {pipeline_mode = #tpu.pipeline_mode<synchronous>, transform_indices = @transform_11, window_bounds = array<i64: 1, 128>}, {transform_indices = @transform_12, window_bounds = array<i64: 1, 16, 128>}]} {
    %c0 = arith.constant 0 : index
    %c0_0 = arith.constant 0 : index
    %c0_1 = arith.constant 0 : index
    %0 = vector.load %arg1[%c0, %c0_0, %c0_1] : memref<1x16x128xf32, #tpu.memory_space<vmem>>, vector<1x16x128xf32>
    %1 = vector.shape_cast %0 : vector<1x16x128xf32> to vector<16x128xf32>
    %c0_2 = arith.constant 0 : index
    %c0_3 = arith.constant 0 : index
    %c0_4 = arith.constant 0 : index
    %2 = vector.load %arg2[%c0_2, %c0_3, %c0_4] : memref<1x16x128xf32, #tpu.memory_space<vmem>>, vector<1x16x128xf32>
    %3 = vector.shape_cast %2 : vector<1x16x128xf32> to vector<16x128xf32>
    %c0_5 = arith.constant 0 : index
    %c0_6 = arith.constant 0 : index
    %c0_7 = arith.constant 0 : index
    %4 = vector.load %arg3[%c0_5, %c0_6, %c0_7] : memref<1x16x128xf32, #tpu.memory_space<vmem>>, vector<1x16x128xf32>
    %5 = vector.shape_cast %4 : vector<1x16x128xf32> to vector<16x128xf32>
    %c0_8 = arith.constant 0 : index
    %c0_9 = arith.constant 0 : index
    %6 = vector.load %arg5[%c0_8, %c0_9] : memref<128x128xf32, #tpu.memory_space<vmem>>, vector<128x128xf32>
    %cst = arith.constant dense<0.000000e+00> : vector<16x128xf32>
    %7 = tpu.matmul %1, %6, %cst {dimension_numbers = #tpu.dot_dimension_numbers<[1], [0], [0], [1], [0, 0, 1, 1], [], []>} : vector<16x128xf32>, vector<128x128xf32>, vector<16x128xf32> -> vector<16x128xf32>
    %c0_10 = arith.constant 0 : index
    %c0_11 = arith.constant 0 : index
    %8 = vector.load %arg8[%c0_10, %c0_11] : memref<1x128xf32, #tpu.memory_space<vmem>>, vector<1x128xf32>
    %9 = vector.broadcast %8 : vector<1x128xf32> to vector<16x128xf32>
    %10 = arith.addf %7, %9 : vector<16x128xf32>
    %c0_12 = arith.constant 0 : index
    %c0_13 = arith.constant 0 : index
    %11 = vector.load %arg6[%c0_12, %c0_13] : memref<128x128xf32, #tpu.memory_space<vmem>>, vector<128x128xf32>
    %cst_14 = arith.constant dense<0.000000e+00> : vector<16x128xf32>
    %12 = tpu.matmul %3, %11, %cst_14 {dimension_numbers = #tpu.dot_dimension_numbers<[1], [0], [0], [1], [0, 0, 1, 1], [], []>} : vector<16x128xf32>, vector<128x128xf32>, vector<16x128xf32> -> vector<16x128xf32>
    %c0_15 = arith.constant 0 : index
    %c0_16 = arith.constant 0 : index
    %13 = vector.load %arg9[%c0_15, %c0_16] : memref<1x128xf32, #tpu.memory_space<vmem>>, vector<1x128xf32>
    %14 = vector.broadcast %13 : vector<1x128xf32> to vector<16x128xf32>
    %15 = arith.addf %12, %14 : vector<16x128xf32>
    %c0_17 = arith.constant 0 : index
    %c0_18 = arith.constant 0 : index
    %16 = vector.load %arg7[%c0_17, %c0_18] : memref<128x128xf32, #tpu.memory_space<vmem>>, vector<128x128xf32>
    %cst_19 = arith.constant dense<0.000000e+00> : vector<16x128xf32>
    %17 = tpu.matmul %5, %16, %cst_19 {dimension_numbers = #tpu.dot_dimension_numbers<[1], [0], [0], [1], [0, 0, 1, 1], [], []>} : vector<16x128xf32>, vector<128x128xf32>, vector<16x128xf32> -> vector<16x128xf32>
    %c0_20 = arith.constant 0 : index
    %c0_21 = arith.constant 0 : index
    %18 = vector.load %arg10[%c0_20, %c0_21] : memref<1x128xf32, #tpu.memory_space<vmem>>, vector<1x128xf32>
    %19 = vector.broadcast %18 : vector<1x128xf32> to vector<16x128xf32>
    %20 = arith.addf %17, %19 : vector<16x128xf32>
    %c0_22 = arith.constant 0 : index
    %c0_23 = arith.constant 0 : index
    %c0_24 = arith.constant 0 : index
    %21 = vector.load %arg4[%c0_22, %c0_23, %c0_24] : memref<1x16x16xi8, #tpu.memory_space<vmem>>, vector<1x16x16xi8>
    %22 = vector.shape_cast %21 : vector<1x16x16xi8> to vector<16x16xi8>
    %23 = arith.sitofp %22 : vector<16x16xi8> to vector<16x16xf32>
    %cst_25 = arith.constant 0.000000e+00 : f32
    %24 = vector.broadcast %cst_25 : f32 to vector<16x16xf32>
    %25 = arith.cmpf oeq, %23, %24 : vector<16x16xf32>
    %cst_26 = arith.constant -1.000000e+09 : f32
    %cst_27 = arith.constant 0.000000e+00 : f32
    %26 = vector.broadcast %cst_26 : f32 to vector<16x16xf32>
    %27 = vector.broadcast %cst_27 : f32 to vector<16x16xf32>
    %28 = arith.select %25, %26, %27 : vector<16x16xi1>, vector<16x16xf32>
    %29 = vector.extract_strided_slice %10 {offsets = [0, 0], sizes = [16, 32], strides = [1, 1]} : vector<16x128xf32> to vector<16x32xf32>
    %30 = vector.extract_strided_slice %15 {offsets = [0, 0], sizes = [16, 32], strides = [1, 1]} : vector<16x128xf32> to vector<16x32xf32>
    %31 = vector.extract_strided_slice %20 {offsets = [0, 0], sizes = [16, 32], strides = [1, 1]} : vector<16x128xf32> to vector<16x32xf32>
    %cst_28 = arith.constant dense<0.000000e+00> : vector<16x16xf32>
    %32 = tpu.matmul %29, %30, %cst_28 {dimension_numbers = #tpu.dot_dimension_numbers<[1], [1], [0], [0], [0, 0, 1, 0], [], []>} : vector<16x32xf32>, vector<16x32xf32>, vector<16x16xf32> -> vector<16x16xf32>
    %cst_29 = arith.constant 0.176776692 : f32
    %33 = vector.broadcast %cst_29 : f32 to vector<16x16xf32>
    %34 = arith.mulf %32, %33 : vector<16x16xf32>
    %35 = arith.addf %34, %28 : vector<16x16xf32>
    %cst_30 = arith.constant dense<0xFF800000> : vector<16xf32>
    %36 = vector.multi_reduction <maximumf>, %35, %cst_30 [1] : vector<16x16xf32> to vector<16xf32>
    %37 = vector.shape_cast %36 : vector<16xf32> to vector<16x1xf32>
    %38 = vector.broadcast %37 : vector<16x1xf32> to vector<16x16xf32>
    %39 = arith.subf %35, %38 : vector<16x16xf32>
    %40 = math.exp %39 : vector<16x16xf32>
    %cst_31 = arith.constant dense<0.000000e+00> : vector<16xf32>
    %41 = vector.multi_reduction <add>, %40, %cst_31 [1] : vector<16x16xf32> to vector<16xf32>
    %42 = vector.shape_cast %41 : vector<16xf32> to vector<16x1xf32>
    %43 = vector.broadcast %42 : vector<16x1xf32> to vector<16x16xf32>
    %44 = arith.divf %40, %43 : vector<16x16xf32>
    %cst_32 = arith.constant dense<0.000000e+00> : vector<16x32xf32>
    %45 = tpu.matmul %44, %31, %cst_32 {dimension_numbers = #tpu.dot_dimension_numbers<[1], [0], [0], [1], [0, 0, 1, 1], [], []>} : vector<16x16xf32>, vector<16x32xf32>, vector<16x32xf32> -> vector<16x32xf32>
    %c0_33 = arith.constant 0 : index
    %c0_34 = arith.constant 0 : index
    %46 = vector.load %arg14[%c0_33, %c0_34] : memref<16x128xf32, #tpu.memory_space<vmem>>, vector<16x32xf32>
    tpu.vector_store %arg14[%c0_33, %c0_34], %45 {strides = array<i32>} : memref<16x128xf32, #tpu.memory_space<vmem>>, vector<16x32xf32>,
    %47 = vector.extract_strided_slice %10 {offsets = [0, 32], sizes = [16, 32], strides = [1, 1]} : vector<16x128xf32> to vector<16x32xf32>
    %48 = vector.extract_strided_slice %15 {offsets = [0, 32], sizes = [16, 32], strides = [1, 1]} : vector<16x128xf32> to vector<16x32xf32>
    %49 = vector.extract_strided_slice %20 {offsets = [0, 32], sizes = [16, 32], strides = [1, 1]} : vector<16x128xf32> to vector<16x32xf32>
    %cst_35 = arith.constant dense<0.000000e+00> : vector<16x16xf32>
    %50 = tpu.matmul %47, %48, %cst_35 {dimension_numbers = #tpu.dot_dimension_numbers<[1], [1], [0], [0], [0, 0, 1, 0], [], []>} : vector<16x32xf32>, vector<16x32xf32>, vector<16x16xf32> -> vector<16x16xf32>
    %cst_36 = arith.constant 0.176776692 : f32
    %51 = vector.broadcast %cst_36 : f32 to vector<16x16xf32>
    %52 = arith.mulf %50, %51 : vector<16x16xf32>
    %53 = arith.addf %52, %28 : vector<16x16xf32>
    %cst_37 = arith.constant dense<0xFF800000> : vector<16xf32>
    %54 = vector.multi_reduction <maximumf>, %53, %cst_37 [1] : vector<16x16xf32> to vector<16xf32>
    %55 = vector.shape_cast %54 : vector<16xf32> to vector<16x1xf32>
    %56 = vector.broadcast %55 : vector<16x1xf32> to vector<16x16xf32>
    %57 = arith.subf %53, %56 : vector<16x16xf32>
    %58 = math.exp %57 : vector<16x16xf32>
    %cst_38 = arith.constant dense<0.000000e+00> : vector<16xf32>
    %59 = vector.multi_reduction <add>, %58, %cst_38 [1] : vector<16x16xf32> to vector<16xf32>
    %60 = vector.shape_cast %59 : vector<16xf32> to vector<16x1xf32>
    %61 = vector.broadcast %60 : vector<16x1xf32> to vector<16x16xf32>
    %62 = arith.divf %58, %61 : vector<16x16xf32>
    %cst_39 = arith.constant dense<0.000000e+00> : vector<16x32xf32>
    %63 = tpu.matmul %62, %49, %cst_39 {dimension_numbers = #tpu.dot_dimension_numbers<[1], [0], [0], [1], [0, 0, 1, 1], [], []>} : vector<16x16xf32>, vector<16x32xf32>, vector<16x32xf32> -> vector<16x32xf32>
    %c0_40 = arith.constant 0 : index
    %c32 = arith.constant 32 : index
    %64 = vector.load %arg14[%c0_40, %c32] : memref<16x128xf32, #tpu.memory_space<vmem>>, vector<16x32xf32>
    tpu.vector_store %arg14[%c0_40, %c32], %63 {strides = array<i32>} : memref<16x128xf32, #tpu.memory_space<vmem>>, vector<16x32xf32>,
    %65 = vector.extract_strided_slice %10 {offsets = [0, 64], sizes = [16, 32], strides = [1, 1]} : vector<16x128xf32> to vector<16x32xf32>
    %66 = vector.extract_strided_slice %15 {offsets = [0, 64], sizes = [16, 32], strides = [1, 1]} : vector<16x128xf32> to vector<16x32xf32>
    %67 = vector.extract_strided_slice %20 {offsets = [0, 64], sizes = [16, 32], strides = [1, 1]} : vector<16x128xf32> to vector<16x32xf32>
    %cst_41 = arith.constant dense<0.000000e+00> : vector<16x16xf32>
    %68 = tpu.matmul %65, %66, %cst_41 {dimension_numbers = #tpu.dot_dimension_numbers<[1], [1], [0], [0], [0, 0, 1, 0], [], []>} : vector<16x32xf32>, vector<16x32xf32>, vector<16x16xf32> -> vector<16x16xf32>
    %cst_42 = arith.constant 0.176776692 : f32
    %69 = vector.broadcast %cst_42 : f32 to vector<16x16xf32>
    %70 = arith.mulf %68, %69 : vector<16x16xf32>
    %71 = arith.addf %70, %28 : vector<16x16xf32>
    %cst_43 = arith.constant dense<0xFF800000> : vector<16xf32>
    %72 = vector.multi_reduction <maximumf>, %71, %cst_43 [1] : vector<16x16xf32> to vector<16xf32>
    %73 = vector.shape_cast %72 : vector<16xf32> to vector<16x1xf32>
    %74 = vector.broadcast %73 : vector<16x1xf32> to vector<16x16xf32>
    %75 = arith.subf %71, %74 : vector<16x16xf32>
    %76 = math.exp %75 : vector<16x16xf32>
    %cst_44 = arith.constant dense<0.000000e+00> : vector<16xf32>
    %77 = vector.multi_reduction <add>, %76, %cst_44 [1] : vector<16x16xf32> to vector<16xf32>
    %78 = vector.shape_cast %77 : vector<16xf32> to vector<16x1xf32>
    %79 = vector.broadcast %78 : vector<16x1xf32> to vector<16x16xf32>
    %80 = arith.divf %76, %79 : vector<16x16xf32>
    %cst_45 = arith.constant dense<0.000000e+00> : vector<16x32xf32>
    %81 = tpu.matmul %80, %67, %cst_45 {dimension_numbers = #tpu.dot_dimension_numbers<[1], [0], [0], [1], [0, 0, 1, 1], [], []>} : vector<16x16xf32>, vector<16x32xf32>, vector<16x32xf32> -> vector<16x32xf32>
    %c0_46 = arith.constant 0 : index
    %c64 = arith.constant 64 : index
    %82 = vector.load %arg14[%c0_46, %c64] : memref<16x128xf32, #tpu.memory_space<vmem>>, vector<16x32xf32>
    tpu.vector_store %arg14[%c0_46, %c64], %81 {strides = array<i32>} : memref<16x128xf32, #tpu.memory_space<vmem>>, vector<16x32xf32>,
    %83 = vector.extract_strided_slice %10 {offsets = [0, 96], sizes = [16, 32], strides = [1, 1]} : vector<16x128xf32> to vector<16x32xf32>
    %84 = vector.extract_strided_slice %15 {offsets = [0, 96], sizes = [16, 32], strides = [1, 1]} : vector<16x128xf32> to vector<16x32xf32>
    %85 = vector.extract_strided_slice %20 {offsets = [0, 96], sizes = [16, 32], strides = [1, 1]} : vector<16x128xf32> to vector<16x32xf32>
    %cst_47 = arith.constant dense<0.000000e+00> : vector<16x16xf32>
    %86 = tpu.matmul %83, %84, %cst_47 {dimension_numbers = #tpu.dot_dimension_numbers<[1], [1], [0], [0], [0, 0, 1, 0], [], []>} : vector<16x32xf32>, vector<16x32xf32>, vector<16x16xf32> -> vector<16x16xf32>
    %cst_48 = arith.constant 0.176776692 : f32
    %87 = vector.broadcast %cst_48 : f32 to vector<16x16xf32>
    %88 = arith.mulf %86, %87 : vector<16x16xf32>
    %89 = arith.addf %88, %28 : vector<16x16xf32>
    %cst_49 = arith.constant dense<0xFF800000> : vector<16xf32>
    %90 = vector.multi_reduction <maximumf>, %89, %cst_49 [1] : vector<16x16xf32> to vector<16xf32>
    %91 = vector.shape_cast %90 : vector<16xf32> to vector<16x1xf32>
    %92 = vector.broadcast %91 : vector<16x1xf32> to vector<16x16xf32>
    %93 = arith.subf %89, %92 : vector<16x16xf32>
    %94 = math.exp %93 : vector<16x16xf32>
    %cst_50 = arith.constant dense<0.000000e+00> : vector<16xf32>
    %95 = vector.multi_reduction <add>, %94, %cst_50 [1] : vector<16x16xf32> to vector<16xf32>
    %96 = vector.shape_cast %95 : vector<16xf32> to vector<16x1xf32>
    %97 = vector.broadcast %96 : vector<16x1xf32> to vector<16x16xf32>
    %98 = arith.divf %94, %97 : vector<16x16xf32>
    %cst_51 = arith.constant dense<0.000000e+00> : vector<16x32xf32>
    %99 = tpu.matmul %98, %85, %cst_51 {dimension_numbers = #tpu.dot_dimension_numbers<[1], [0], [0], [1], [0, 0, 1, 1], [], []>} : vector<16x16xf32>, vector<16x32xf32>, vector<16x32xf32> -> vector<16x32xf32>
    %c0_52 = arith.constant 0 : index
    %c96 = arith.constant 96 : index
    %100 = vector.load %arg14[%c0_52, %c96] : memref<16x128xf32, #tpu.memory_space<vmem>>, vector<16x32xf32>
    tpu.vector_store %arg14[%c0_52, %c96], %99 {strides = array<i32>} : memref<16x128xf32, #tpu.memory_space<vmem>>, vector<16x32xf32>,
    %c0_53 = arith.constant 0 : index
    %c0_54 = arith.constant 0 : index
    %101 = vector.load %arg14[%c0_53, %c0_54] : memref<16x128xf32, #tpu.memory_space<vmem>>, vector<16x128xf32>
    %c0_55 = arith.constant 0 : index
    %c0_56 = arith.constant 0 : index
    %102 = vector.load %arg11[%c0_55, %c0_56] : memref<128x128xf32, #tpu.memory_space<vmem>>, vector<128x128xf32>
    %cst_57 = arith.constant dense<0.000000e+00> : vector<16x128xf32>
    %103 = tpu.matmul %101, %102, %cst_57 {dimension_numbers = #tpu.dot_dimension_numbers<[1], [0], [0], [1], [0, 0, 1, 1], [], []>} : vector<16x128xf32>, vector<128x128xf32>, vector<16x128xf32> -> vector<16x128xf32>
    %c0_58 = arith.constant 0 : index
    %c0_59 = arith.constant 0 : index
    %104 = vector.load %arg12[%c0_58, %c0_59] : memref<1x128xf32, #tpu.memory_space<vmem>>, vector<1x128xf32>
    %105 = vector.broadcast %104 : vector<1x128xf32> to vector<16x128xf32>
    %106 = arith.addf %103, %105 : vector<16x128xf32>
    %c0_60 = arith.constant 0 : index
    %c0_61 = arith.constant 0 : index
    %c0_62 = arith.constant 0 : index
    %107 = vector.load %arg13[%c0_60, %c0_61, %c0_62] : memref<1x16x128xf32, #tpu.memory_space<vmem>>, vector<1x16x128xf32>
    %108 = vector.shape_cast %107 : vector<1x16x128xf32> to vector<16x128xf32>
    %109 = vector.shape_cast %106 : vector<16x128xf32> to vector<1x16x128xf32>
    tpu.vector_store %arg13[%c0_60, %c0_61, %c0_62], %109 {strides = array<i32>} : memref<1x16x128xf32, #tpu.memory_space<vmem>>, vector<1x16x128xf32>,
    return
  }
  func.func @transform_0(%arg0: i32) -> (i32, i32, i32) {
    %c0_i32 = arith.constant 0 : i32
    %c0_i32_0 = arith.constant 0 : i32
    %c0_i32_1 = arith.constant 0 : i32
    return %arg0, %c0_i32, %c0_i32_0 : i32, i32, i32
  }
  func.func @transform_1(%arg0: i32) -> (i32, i32, i32) {
    %c0_i32 = arith.constant 0 : i32
    %c0_i32_0 = arith.constant 0 : i32
    %c0_i32_1 = arith.constant 0 : i32
    return %arg0, %c0_i32, %c0_i32_0 : i32, i32, i32
  }
  func.func @transform_2(%arg0: i32) -> (i32, i32, i32) {
    %c0_i32 = arith.constant 0 : i32
    %c0_i32_0 = arith.constant 0 : i32
    %c0_i32_1 = arith.constant 0 : i32
    return %arg0, %c0_i32, %c0_i32_0 : i32, i32, i32
  }
  func.func @transform_3(%arg0: i32) -> (i32, i32, i32) {
    %c0_i32 = arith.constant 0 : i32
    %c0_i32_0 = arith.constant 0 : i32
    %c0_i32_1 = arith.constant 0 : i32
    return %arg0, %c0_i32, %c0_i32_0 : i32, i32, i32
  }
  func.func @transform_4(%arg0: i32) -> (i32, i32) {
    %c0_i32 = arith.constant 0 : i32
    %c0_i32_0 = arith.constant 0 : i32
    %c0_i32_1 = arith.constant 0 : i32
    return %c0_i32, %c0_i32_0 : i32, i32
  }
  func.func @transform_5(%arg0: i32) -> (i32, i32) {
    %c0_i32 = arith.constant 0 : i32
    %c0_i32_0 = arith.constant 0 : i32
    %c0_i32_1 = arith.constant 0 : i32
    return %c0_i32, %c0_i32_0 : i32, i32
  }
  func.func @transform_6(%arg0: i32) -> (i32, i32) {
    %c0_i32 = arith.constant 0 : i32
    %c0_i32_0 = arith.constant 0 : i32
    %c0_i32_1 = arith.constant 0 : i32
    return %c0_i32, %c0_i32_0 : i32, i32
  }
  func.func @transform_7(%arg0: i32) -> (i32, i32) {
    %c0_i32 = arith.constant 0 : i32
    %c0_i32_0 = arith.constant 0 : i32
    %c0_i32_1 = arith.constant 0 : i32
    return %c0_i32, %c0_i32_0 : i32, i32
  }
  func.func @transform_8(%arg0: i32) -> (i32, i32) {
    %c0_i32 = arith.constant 0 : i32
    %c0_i32_0 = arith.constant 0 : i32
    %c0_i32_1 = arith.constant 0 : i32
    return %c0_i32, %c0_i32_0 : i32, i32
  }
  func.func @transform_9(%arg0: i32) -> (i32, i32) {
    %c0_i32 = arith.constant 0 : i32
    %c0_i32_0 = arith.constant 0 : i32
    %c0_i32_1 = arith.constant 0 : i32
    return %c0_i32, %c0_i32_0 : i32, i32
  }
  func.func @transform_10(%arg0: i32) -> (i32, i32) {
    %c0_i32 = arith.constant 0 : i32
    %c0_i32_0 = arith.constant 0 : i32
    %c0_i32_1 = arith.constant 0 : i32
    return %c0_i32, %c0_i32_0 : i32, i32
  }
  func.func @transform_11(%arg0: i32) -> (i32, i32) {
    %c0_i32 = arith.constant 0 : i32
    %c0_i32_0 = arith.constant 0 : i32
    %c0_i32_1 = arith.constant 0 : i32
    return %c0_i32, %c0_i32_0 : i32, i32
  }
  func.func @transform_12(%arg0: i32) -> (i32, i32, i32) {
    %c0_i32 = arith.constant 0 : i32
    %c0_i32_0 = arith.constant 0 : i32
    %c0_i32_1 = arith.constant 0 : i32
    return %arg0, %c0_i32, %c0_i32_0 : i32, i32, i32
  }
}

</mosaic_0001>

<bundles_post_ra>
// kernel: tpu_custom_call.1
= control target key start
LH: loop header
LB: loop body
LE: loop exit
PB: predicated region body
PF: predicated region fallthrough
CT: control target
= control target key end

     0   :  { %s3624_s0 = inlined_call_operand.hbm [shape: f32[2,16,128], index: 0, kind: input, shape index: {}]   ;;  %s3625_s1 = inlined_call_operand.hbm [shape: f32[2,16,128], index: 1, kind: input, shape index: {}]   ;;  %s3626_s2 = inlined_call_operand.hbm [shape: f32[2,16,128], index: 2, kind: input, shape index: {}]   ;;  %s3627_s3 = inlined_call_operand.vmem [shape: s8[2,16,16], index: 3, kind: input, shape index: {}]   ;;  %s3628_s4 = inlined_call_operand.hbm [shape: f32[128,128], index: 4, kind: input, shape index: {}]   ;;  %s3629_s5 = inlined_call_operand.hbm [shape: f32[128,128], index: 5, kind: input, shape index: {}]   ;;  %s3630_s6 = inlined_call_operand.hbm [shape: f32[128,128], index: 6, kind: input, shape index: {}]   ;;  %s3631_s7 = inlined_call_operand.vmem [shape: f32[1,128], index: 7, kind: input, shape index: {}]   ;;  %s3632_s8 = inlined_call_operand.vmem [shape: f32[1,128], index: 8, kind: input, shape index: {}]   ;;  %s3633_s9 = inlined_call_operand.vmem [shape: f32[1,128], index: 9, kind: input, shape index: {}]   ;;  %s3634_s10 = inlined_call_operand.hbm [shape: f32[128,128], index: 10, kind: input, shape index: {}]   ;;  %s3635_s11 = inlined_call_operand.vmem [shape: f32[1,128], index: 11, kind: input, shape index: {}]   ;;  %s3636_s12 = inlined_call_operand.hbm [shape: f32[2,16,128], index: 12, kind: output, shape index: {}]  }
   0x1   :  { %3662 = sst [smem:[#allocation27_spill]] %s3625_s1 }
   0x2   :  { %3663 = sst [smem:[#allocation28_spill]] %s3627_s3 }
   0x3   :  { %3664 = sst [smem:[#allocation29_spill]] %s3628_s4 }
   0x4   :  { %3665 = sst [smem:[#allocation30_spill]] %s3630_s6 }
   0x5   :  { %3666 = sst [smem:[#allocation31_spill]] %s3631_s7 }
   0x6   :  { %3667 = sst [smem:[#allocation32_spill]] %s3633_s9 }
   0x7   :  { %3668 = sst [smem:[#allocation33_spill]] %s3635_s11 }
   0x8   :  { %3669 = sst [smem:[#allocation34_spill]] %s3636_s12 }
   0x9   :  { %17 = vsyncpa [#allocation4], 0 }
   0xa   :  { %19 = vsyncpa [#allocation4 + $0x1], 0 }
   0xb   :  { %20 = vsyncpa [#allocation7], 0 }
   0xc   :  { %22 = vsyncpa [#allocation7 + $0x1], 0 }
   0xd   :  { %23 = vsyncpa [#allocation10], 0 }
   0xe   :  { %24 = vsyncpa [#allocation13], 0 }
   0xf   :  { %25 = vsyncpa [#allocation5], 0 }
  0x10   :  { %27 = vsyncpa [#allocation5 + $0x1], 0  ;;  %s3091_s21 = smov 0   ;;  %s3093_s22 = smov 0  }
  0x11   :  { %s3095_s23 = smov 0   ;;  %s3097_s24 = smov 0  }
  0x12 LB: > { %3670 = sst [smem:[#allocation21_spill]] %s2996_s21  ;;  %s3112_s25 = sadd.s32 4294967295, %s3008_s24   ;;  %s3008_s24 = sphi %s3097_s24, %s3715_s24   ;;  %s3004_s23 = sphi %s3095_s23, %s3719_s23   ;;  %s3000_s22 = sphi %s3093_s22, %s3718_s22   ;;  %s2996_s21 = sphi %s3091_s21, %s3717_s21  }
  0x13   : > { %3671 = sst [smem:[#allocation22_spill]] %s3008_s24  ;;  %s2024_s26 = sadd.s32 4294967294, %s3008_s24  }
  0x14   : > { %p53_p0 = scmp.ne.s32.totalorder %s3000_s22, %s2996_s21  ;;  %p3638_p1 = scmp.eq.s32.totalorder %s3112_s25, 0 }
  0x15   : > { %p329_p3 = scmp.eq.s32.totalorder %s2024_s26, 1  ;;  %p2025_p5 = scmp.ge.s32.totalorder %s3008_s24, 1 }
  0x16   : > { %p3121_p4 = por %p3638_p1, %p53_p0  ;;  %p336_p7 = scmp.lt.s32.totalorder %s3008_s24, 3 }
  0x17   : > { %p3126_p6 = por %p329_p3, %p53_p0  ;;  %s3010_s30 = smov [#allocation9]  }
  0x18   : > { %s3672_s27 = scalar_select %p3121_p4, 1, 0 }
  0x19   : > { %s3673_s28 = scalar_select %p3126_p6, 1, 0 }
  0x1a   : > { %p3131_p8 = pnand %p2025_p5, %p336_p7  ;;  %s348_s13 = sshll.u32 %s3010_s30, 4  ;;  %s3135_s13 = int_to_ptr.vmem [resolvable:$true] %s348_s13 }
  0x1b   : > { %3674 = sst [smem:[#allocation23_spill]] %s3673_s28  ;;  %s3011_s15 = smov [#allocation12]  }
  0x1c   : > { %s3675_s29 = scalar_select %p3131_p8, 1, 0 }
  0x1d   : > { %p2585_p9 = pneg %p3131_p8  ;;  %s374_s16 = sshll.u32 %s3011_s15, 4  ;;  %s3146_s16 = int_to_ptr.vmem [resolvable:$true] %s374_s16 }
  0x1e   : > { %s3677_s4 = sld [smem:[#allocation29_spill]] }
  0x1f   : > { %p3142_p11 = pnand %p2585_p9, %p3638_p1 }
  0x21   : > { %s3676_s14 = scalar_select %p3142_p11, 1, 0 }
  0x22   : > { %p3156_p13 = pneg %p3142_p11 }
  0x24   : > { %s2728_s19 = scalar_lea.hbm %s3677_s4, 2048 }
  0x25   : > { %p2729_p12 = scmp.ne.s32.totalorder %s3677_s4, %s2728_s19  ;;  %p2735_p5 = scmp.lt.u32.totalorder %s2728_s19, %s3677_s4 }
  0x26   : > { %s3678_s30 = scalar_select %p3156_p13, 1, 0 }
  0x27   : > { %p2731_p0 = pnand %p3156_p13, %p2729_p12 }
  0x29   : > { %p2732_p3 = pneg %p2731_p0 }
  0x2b   : > { %p2737_p7 = pnand %p2735_p5, %p2732_p3 }
  0x2d   : > { %2740 = shalt.err (!%p2737_p7)
}
  0x2e   : > { %s2741_s17 = scalar_lea.vmem %s3135_s13, 2048  ;;  %p2749_p2 = scmp.lt.s32.totalorder %s3135_s13, %s3135_s13 }
  0x2f   : > { %p2742_p9 = scmp.ne.s32.totalorder %s3135_s13, %s2741_s17  ;;  %p2750_p6 = scmp.lt.s32.totalorder %s2741_s17, %s2741_s17 }
  0x31   : > { %p2744_p10 = pnand %p2742_p9, %p3156_p13  ;;  %p2751_p12 = por %p2750_p6, %p2749_p2 }
  0x33   : > { %p2745_p1 = pneg %p2744_p10 }
  0x35   : > { %p2752_p0 = pnand %p2751_p12, %p2745_p1 }
  0x37   : > { %2755 = shalt.err (!%p2752_p0)
}
  0x38   : > { %s3642_s18 = smov 128   ;;  %s3644_s28 = smov 8  }
  0x39   : > { %2588 = dma.hbm_to_vmem [thread:$0]  (!%p3142_p11), %s3677_s4, 2048, %s3135_s13, [#allocation10], %s3642_s18, %s3642_s18, %s3644_s28  }
  0x3a   : > { %s3679_s6 = sld [smem:[#allocation30_spill]] }
  0x40   : > { %s2756_s17 = scalar_lea.hbm %s3679_s6, 2048 }
  0x41   : > { %p2757_p1 = scmp.ne.s32.totalorder %s3679_s6, %s2756_s17  ;;  %p2763_p10 = scmp.lt.u32.totalorder %s2756_s17, %s3679_s6 }
  0x43   : > { %p2759_p2 = pnand %p2757_p1, %p3156_p13 }
  0x45   : > { %p2760_p6 = pneg %p2759_p2 }
  0x47   : > { %p2765_p3 = pnand %p2763_p10, %p2760_p6 }
  0x49   : > { %2768 = shalt.err (!%p2765_p3)
}
  0x4a   : > { %s2769_s13 = scalar_lea.vmem %s3146_s16, 2048  ;;  %p2777_p12 = scmp.lt.s32.totalorder %s3146_s16, %s3146_s16 }
  0x4b   : > { %p2770_p5 = scmp.ne.s32.totalorder %s3146_s16, %s2769_s13  ;;  %p2778_p0 = scmp.lt.s32.totalorder %s2769_s13, %s2769_s13 }
  0x4d   : > { %p2772_p7 = pnand %p2770_p5, %p3156_p13  ;;  %p2779_p1 = por %p2778_p0, %p2777_p12 }
  0x4f   : > { %p2773_p9 = pneg %p2772_p7 }
  0x51   : > { %p2780_p2 = pnand %p2779_p1, %p2773_p9 }
  0x53   : > { %2783 = shalt.err (!%p2780_p2)
}
  0x54   : > { %2594 = dma.hbm_to_vmem [thread:$0]  (!%p3142_p11), %s3679_s6, 2048, %s3146_s16, [#allocation13], %s3642_s18, %s3642_s18, %s3644_s28  }
  0x55   : > { %s3207_s12 = sadd.s32 1, %s3008_s24   ;;  %s40_s21 = sadd.s32 1, %s3004_s23 }
  0x56   : > { %3680 = sst [smem:[#allocation24_spill]] %s3207_s12  ;;  %s37_s19 = ssub.s32 %s3008_s24, %s3207_s12 }
  0x57   : > { %p47_p6 = scmp.ne.s32.totalorder %s3004_s23, %s3000_s22  ;;  %p38_p10 = scmp.eq.s32.totalorder %s37_s19, 0 }
  0x58   : > { %p48_p3 = scmp.eq.s32.totalorder %s3008_s24, 0  ;;  %p3681_p5 = scmp.eq.s32.totalorder %s3112_s25, 1 }
  0x59   : > { %p2616_p9 = scmp.lt.s32.totalorder %s3008_s24, 2  ;;  %s3641_s15 = sand.u32 1, %s3004_s23  }
  0x5a   : > { %p3217_p7 = por %p3681_p5, %p47_p6  ;;  %p49_p12 = por %p48_p3, %p47_p6 }
  0x5b   : > { %s3223_s26 = scalar_select %p38_p10, %s3004_s23, %s40_s21  }
  0x5c   : > { %s3682_s20 = scalar_select %p3217_p7, 1, 0 }
  0x5d   : > { %3684 = sst [smem:[#allocation26_spill]] %s3223_s26  ;;  %s3228_s16 = sshll.u32 %s3641_s15, 4 }
  0x5e   : > { %3683 = sst [smem:[#allocation25_spill]] %s3682_s20  ;;  %s3231_s17 = sshll.u32 %s3008_s24, 8 }
  0x5f   : > { %p3233_p0 = pnand %p2616_p9, %p49_p12  ;;  %s434_s9 = sand.u32 1, %s3008_s24  }
  0x60   : > { %s3686_s1 = sld [smem:[#allocation27_spill]]  ;;  %s438_s15 = scalar_lea.vmem [#allocation6], %s3228_s16 }
  0x61   : > { %s3685_s13 = scalar_select %p3233_p0, 1, 0 }
  0x62   : > { %s445_s18 = sshll.u32 %s438_s15, 4  ;;  %s3014_s28 = smov [#allocation11]   ;;  %s3245_s18 = int_to_ptr.vmem [resolvable:$true] %s445_s18 }
  0x63   : > { %s3247_s4 = sshll.u32 %s3014_s28, 4  ;;  %s3249_s6 = scalar_lea.sflag [#allocation7], %s434_s9  ;;  %s362_s4 = int_to_ptr.vmem [resolvable:$true] %s3247_s4 }
  0x64   : > { %p3255_p2 = pneg %p3233_p0 }
  0x66   : > { %s3242_s21 = scalar_lea.hbm %s3686_s1, %s3231_s17  ;;  %s2789_s12 = scalar_lea.hbm %s3686_s1, 512 }
  0x67   : > { %s2784_s26 = scalar_lea.hbm %s3242_s21, 256  ;;  %p2790_p3 = scmp.lt.u32.totalorder %s3242_s21, %s3686_s1 }
  0x68   : > { %p2785_p1 = scmp.ne.s32.totalorder %s3242_s21, %s2784_s26  ;;  %p2791_p5 = scmp.lt.u32.totalorder %s2789_s12, %s2784_s26 }
  0x69   : > { %s3687_s11 = scalar_select %p3255_p2, 1, 0 }
  0x6a   : > { %p2787_p6 = pnand %p3255_p2, %p2785_p1  ;;  %p2792_p9 = por %p2791_p5, %p2790_p3 }
  0x6b   : > { %p2793_p12 = scmp.lt.u32.totalorder %s2784_s26, %s3242_s21 }
  0x6c   : > { %p2788_p10 = pneg %p2787_p6 }
  0x6d   : > { %p2794_p7 = por %p2793_p12, %p2792_p9 }
  0x6f   : > { %p2795_p4 = pnand %p2794_p7, %p2788_p10 }
  0x71   : > { %2798 = shalt.err (!%p2795_p4)
}
  0x72   : > { %s2799_s9 = scalar_lea.vmem %s3245_s18, 256  ;;  %s3015_s19 = smov [#allocation6]  }
  0x73   : > { %p2800_p1 = scmp.ne.s32.totalorder %s3245_s18, %s2799_s9  ;;  %s2804_s15 = sshll.u32 %s3015_s19, 4  ;;  %s2805_s15 = int_to_ptr.vmem [resolvable:$false] %s2804_s15 }
  0x74   : > { %s2806_s24 = scalar_lea.vmem %s2805_s15, 512  ;;  %p2807_p11 = scmp.lt.s32.totalorder %s3245_s18, %s2805_s15 }
  0x75   : > { %p2802_p6 = pnand %p2800_p1, %p3255_p2  ;;  %p2808_p13 = scmp.lt.s32.totalorder %s2806_s24, %s2799_s9 }
  0x77   : > { %p2803_p8 = pneg %p2802_p6  ;;  %p2809_p3 = por %p2808_p13, %p2807_p11 }
  0x79   : > { %p2810_p5 = pnand %p2809_p3, %p2803_p8 }
  0x7b   : > { %2813 = shalt.err (!%p2810_p5)
}
  0x7c   : > { %s3688_s12 = smov 8   ;;  %s3689_s26 = smov 128  }
  0x7d   : > { %2604 = dma.hbm_to_vmem [thread:$0]  (!%p3233_p0), %s3242_s21, 256, %s3245_s18, %s3249_s6, %s3689_s26, %s3689_s26, %s3688_s12  }
  0x7e   : > { %s2814_s15 = scalar_lea.hbm %s3629_s5, 2048  ;;  %p3690_p8 = scmp.ne.s32.totalorder %s3678_s30, 0 }
  0x7f   : > { %p2815_p4 = scmp.ne.s32.totalorder %s3629_s5, %s2814_s15  ;;  %p2821_p7 = scmp.lt.u32.totalorder %s2814_s15, %s3629_s5 }
  0x81   : > { %p2817_p11 = pnand %p2815_p4, %p3690_p8 }
  0x83   : > { %p2818_p13 = pneg %p2817_p11 }
  0x85   : > { %p2823_p10 = pnand %p2821_p7, %p2818_p13 }
  0x87   : > { %2826 = shalt.err (!%p2823_p10)
}
  0x88   : > { %s2827_s3 = scalar_lea.vmem %s362_s4, 2048  ;;  %p2835_p6 = scmp.lt.s32.totalorder %s362_s4, %s362_s4 }
  0x89   : > { %p2828_p9 = scmp.ne.s32.totalorder %s362_s4, %s2827_s3  ;;  %p2836_p3 = scmp.lt.s32.totalorder %s2827_s3, %s2827_s3 }
  0x8b   : > { %p2830_p12 = pnand %p2828_p9, %p3690_p8  ;;  %p2837_p5 = por %p2836_p3, %p2835_p6 }
  0x8d   : > { %p2831_p1 = pneg %p2830_p12 }
  0x8f   : > { %p2838_p0 = pnand %p2837_p5, %p2831_p1 }
  0x91   : > { %2841 = shalt.err (!%p2838_p0)
}
  0x92   : > { %p3691_p4 = scmp.ne.s32.totalorder %s3676_s14, 0  ;;  %s3016_s20 = smov [#allocation14]  }
  0x93   : > { %s396_s21 = sshll.u32 %s3016_s20, 4  ;;  %s2842_s3 = scalar_lea.hbm %s3634_s10, 2048  ;;  %s397_s21 = int_to_ptr.vmem [resolvable:$true] %s396_s21 }
  0x94   : > { %2591 = dma.hbm_to_vmem [thread:$0]  (!%p3691_p4), %s3629_s5, 2048, %s362_s4, [#allocation10], %s3689_s26, %s3689_s26, %s3688_s12  }
  0x95   : > { %p2843_p0 = scmp.ne.s32.totalorder %s3634_s10, %s2842_s3  ;;  %p2849_p7 = scmp.lt.u32.totalorder %s2842_s3, %s3634_s10 }
  0x97   : > { %p2845_p11 = pnand %p2843_p0, %p3690_p8 }
  0x99   : > { %p2846_p13 = pneg %p2845_p11 }
  0x9b   : > { %p2851_p10 = pnand %p2849_p7, %p2846_p13 }
  0x9d   : > { %2854 = shalt.err (!%p2851_p10)
}
  0x9e   : > { %s2855_s4 = scalar_lea.vmem %s397_s21, 2048  ;;  %p2863_p6 = scmp.lt.s32.totalorder %s397_s21, %s397_s21 }
  0x9f   : > { %p2856_p9 = scmp.ne.s32.totalorder %s397_s21, %s2855_s4  ;;  %p2864_p3 = scmp.lt.s32.totalorder %s2855_s4, %s2855_s4 }
  0xa1   : > { %p2858_p12 = pnand %p2856_p9, %p3690_p8  ;;  %p2865_p5 = por %p2864_p3, %p2863_p6 }
  0xa3   : > { %p2859_p1 = pneg %p2858_p12 }
  0xa5   : > { %p2866_p2 = pnand %p2865_p5, %p2859_p1 }
  0xa7   : > { %2869 = shalt.err (!%p2866_p2)
}
  0xa8   : > { %2597 = dma.hbm_to_vmem [thread:$0]  (!%p3691_p4), %s3634_s10, 2048, %s397_s21, [#allocation13], %s3689_s26, %s3689_s26, %s3688_s12  }
  0xa9   : > { %s3329_s20 = scalar_lea.hbm %s3624_s0, %s3231_s17  ;;  %s417_s14 = scalar_lea.vmem [#allocation3], %s3228_s16 }
  0xaa   : > { %s424_s28 = sshll.u32 %s417_s14, 4  ;;  %s3692_s19 = sand.u32 1, %s3004_s23   ;;  %s3332_s28 = int_to_ptr.vmem [resolvable:$true] %s424_s28 }
  0xab   : > { %s3336_s3 = scalar_lea.sflag [#allocation4], %s3692_s19  ;;  %s2870_s15 = scalar_lea.hbm %s3329_s20, 256 }
  0xac   : > { %p2871_p2 = scmp.ne.s32.totalorder %s3329_s20, %s2870_s15  ;;  %p3693_p8 = scmp.ne.s32.totalorder %s3687_s11, 0 }
  0xad   : > { %s2875_s24 = scalar_lea.hbm %s3624_s0, 512  ;;  %p2876_p11 = scmp.lt.u32.totalorder %s3329_s20, %s3624_s0 }
  0xae   : > { %p2873_p4 = pnand %p2871_p2, %p3693_p8  ;;  %p2877_p13 = scmp.lt.u32.totalorder %s2875_s24, %s2870_s15 }
  0xaf   : > { %p2879_p10 = scmp.lt.u32.totalorder %s2870_s15, %s3329_s20 }
  0xb0   : > { %p2874_p0 = pneg %p2873_p4  ;;  %p2878_p7 = por %p2877_p13, %p2876_p11 }
  0xb2   : > { %p2880_p9 = por %p2879_p10, %p2878_p7 }
  0xb4   : > { %p2881_p12 = pnand %p2880_p9, %p2874_p0 }
  0xb6   : > { %2884 = shalt.err (!%p2881_p12)
}
  0xb7   : > { %s2885_s1 = scalar_lea.vmem %s3332_s28, 256  ;;  %s3017_s30 = smov [#allocation3]  }
  0xb8   : > { %p2886_p1 = scmp.ne.s32.totalorder %s3332_s28, %s2885_s1  ;;  %s2890_s18 = sshll.u32 %s3017_s30, 4  ;;  %s2891_s18 = int_to_ptr.vmem [resolvable:$false] %s2890_s18 }
  0xb9   : > { %s2892_s14 = scalar_lea.vmem %s2891_s18, 512  ;;  %p2893_p5 = scmp.lt.s32.totalorder %s3332_s28, %s2891_s18 }
  0xba   : > { %p2888_p6 = pnand %p2886_p1, %p3693_p8  ;;  %p2894_p2 = scmp.lt.s32.totalorder %s2892_s14, %s2885_s1 }
  0xbc   : > { %p2889_p3 = pneg %p2888_p6  ;;  %p2895_p4 = por %p2894_p2, %p2893_p5 }
  0xbe   : > { %p2896_p11 = pnand %p2895_p4, %p2889_p3 }
  0xc0   : > { %2899 = shalt.err (!%p2896_p11)
}
  0xc1   : > { %p3694_p0 = scmp.ne.s32.totalorder %s3685_s13, 0  ;;  %s3367_s21 = scalar_lea.hbm %s3626_s2, %s3231_s17 }
  0xc2   : > { %s459_s9 = scalar_lea.vmem [#allocation8], %s3228_s16  ;;  %s2900_s4 = scalar_lea.hbm %s3367_s21, 256 }
  0xc3   : > { %2601 = dma.hbm_to_vmem [thread:$0]  (!%p3694_p0), %s3329_s20, 256, %s3332_s28, %s3336_s3, %s3689_s26, %s3689_s26, %s3688_s12  }
  0xc4   : > { %s466_s24 = sshll.u32 %s459_s9, 4  ;;  %p2901_p13 = scmp.ne.s32.totalorder %s3367_s21, %s2900_s4  ;;  %s3370_s24 = int_to_ptr.vmem [resolvable:$true] %s466_s24 }
  0xc5   : > { %s2905_s28 = scalar_lea.hbm %s3626_s2, 512  ;;  %p2906_p9 = scmp.lt.u32.totalorder %s3367_s21, %s3626_s2 }
  0xc6   : > { %p2903_p7 = pnand %p2901_p13, %p3693_p8  ;;  %p2907_p12 = scmp.lt.u32.totalorder %s2905_s28, %s2900_s4 }
  0xc7   : > { %p2909_p6 = scmp.lt.u32.totalorder %s2900_s4, %s3367_s21 }
  0xc8   : > { %p2904_p10 = pneg %p2903_p7  ;;  %p2908_p1 = por %p2907_p12, %p2906_p9 }
  0xca   : > { %p2910_p3 = por %p2909_p6, %p2908_p1 }
  0xcc   : > { %p2911_p5 = pnand %p2910_p3, %p2904_p10 }
  0xce   : > { %2914 = shalt.err (!%p2911_p5)
}
  0xcf   : > { %s2915_s16 = scalar_lea.vmem %s3370_s24, 256  ;;  %s3018_s1 = smov [#allocation8]  }
  0xd0   : > { %p2916_p2 = scmp.ne.s32.totalorder %s3370_s24, %s2915_s16  ;;  %s2920_s30 = sshll.u32 %s3018_s1, 4  ;;  %s2921_s30 = int_to_ptr.vmem [resolvable:$false] %s2920_s30 }
  0xd1   : > { %s2922_s18 = scalar_lea.vmem %s2921_s30, 512  ;;  %p2923_p13 = scmp.lt.s32.totalorder %s3370_s24, %s2921_s30 }
  0xd2   : > { %p2918_p4 = pnand %p2916_p2, %p3693_p8  ;;  %p2924_p7 = scmp.lt.s32.totalorder %s2922_s18, %s2915_s16 }
  0xd4   : > { %p2919_p11 = pneg %p2918_p4  ;;  %p2925_p9 = por %p2924_p7, %p2923_p13 }
  0xd6   : > { %p2926_p12 = pnand %p2925_p9, %p2919_p11 }
  0xd8   : > { %2929 = shalt.err (!%p2926_p12)
}
  0xd9   : > { %2607 = dma.hbm_to_vmem [thread:$0]  (!%p3694_p0), %s3367_s21, 256, %s3370_s24, %s3249_s6, %s3689_s26, %s3689_s26, %s3688_s12  }
  0xda   : > { %p3695_p8 = scmp.ne.s32.totalorder %s3675_s29, 0 }
  0xdb   : > { %s3400_s11 = sand.u32 (!%p3695_p8), 1, %s3000_s22   ;;  %p3696_p10 = scmp.ne.s32.totalorder (!%p3695_p8), %s3672_s27, 0 }
  0xdc   : > { %486 = sbr.rel (%p3695_p8) target bundleno = 3234 (0xca2), region = 68  ;;  %s3403_s14 = sshll.u32 (!%p3695_p8), %s3400_s11, 4 }
  0xdd   : > { %s489_s13 = scalar_lea.sflag (!%p3695_p8), [#allocation4], %s3400_s11  ;;  %s492_s19 = scalar_lea.vmem (!%p3695_p8), [#allocation3], %s3403_s14 }
  0xe3   : > { %2975 = dma.done.wait (%p3696_p10), %s489_s13, 256  }
  0xe4   : > { %2977 = vsyncadd (%p3696_p10), %s489_s13, 4294967040  ;;  %s497_s6 = sand.u32 1, %s3112_s25   ;;  %s501_s12 = scalar_lea.vmem [#allocation6], %s3403_s14 }
  0xe5   : > { %s498_s29 = scalar_lea.sflag [#allocation7], %s497_s6 }
  0xe6   : > { %2979 = dma.done.wait (%p3696_p10), %s498_s29, 512  }
  0xe7   : > { %2981 = vsyncadd (%p3696_p10), %s498_s29, 4294966784  ;;  %s510_s26 = scalar_lea.vmem [#allocation8], %s3403_s14  ;;  %p3697_p0 = scmp.eq.s32.totalorder %s3112_s25, 0 }
  0xe9   : > { %2983 = dma.done.wait (%p3697_p0), [#allocation10], 4096   ;;  %p3698_p1 = pmov %p3697_p0 }
  0xea   : > { %p3699_p6 = pmov %p3697_p0 }
  0xeb   : > { %2985 = vsyncadd (%p3698_p1), [#allocation10], 4294963200 }
  0xec   : > { %2987 = dma.done.wait (%p3699_p6), [#allocation13], 4096   ;;  %p3700_p3 = pmov %p3697_p0 }
  0xed   : > { %v691_v0 = vld [vmem:[#allocation11] sm:$0xff]  ;;  %v692_v1 = vld [vmem:[#allocation11 + $0x8] sm:$0xff]  ;;  %v693_v2 = vld [vmem:[#allocation11 + $0x10] sm:$0xff]  ;;  %vm897_vm0 = vcmask 261120   ;;  %s3701_s24 = sld [smem:[#allocation31_spill]]  ;;  %s3019_s4 = smov 96  }
  0xee   : > { %2989 = vsyncadd (%p3700_p3), [#allocation13], 4294963200  ;;  %v2425_v3 = vpack.c.bf16 %v692_v1, %v691_v0  ;;  %v694_v4 = vld [vmem:[#allocation11 + $0x18] sm:$0xff]  ;;  %v593_v5 = vld [vmem:[#allocation9] sm:$0xff]  ;;  %p582_p5 = scmp.lt.s32.totalorder %s3112_s25, 1  ;;  %s3704_s17 = sld [smem:[#allocation28_spill]] }
  0xef   : > { %v594_v6 = vld [vmem:[#allocation9 + $0x8] sm:$0xff]  ;;  %v2429_v7 = vpack.c.bf16 %v694_v4, %v693_v2  ;;  %v695_v9 = vld [vmem:[#allocation11 + $0x20] sm:$0xff]  ;;  %v595_v11 = vld [vmem:[#allocation9 + $0x10] sm:$0xff]  ;;  %vm989_vm4 = vcmask 130048   ;;  %s3705_s18 = sld [smem:[#allocation32_spill]]  ;;  %s3021_s13 = smov 64  }
  0xf0   : > { %v2393_v8 = vpack.c.bf16 %v594_v6, %v593_v5  ;;  %v696_v10 = vld [vmem:[#allocation11 + $0x28] sm:$0xff]  ;;  %2426 = vmatprep.subr.bf16.mxu1 %v2425_v3  ;;  %v596_v12 = vld [vmem:[#allocation9 + $0x18] sm:$0xff]  ;;  %v597_v14 = vld [vmem:[#allocation9 + $0x20] sm:$0xff]  ;;  %s583_s7 = scalar_select %p582_p5, %s3112_s25, 1  ;;  %vm1309_vm5 = vcmask 523520   ;;  %vm1524_vm6 = vcmask 785920  }
  0xf1   : > { %2428 = vmatpush3.bf16.msra.mxu1 %v2425_v3  ;;  %v2397_v13 = vpack.c.bf16 %v596_v12, %v595_v11  ;;  %v598_v15 = vld [vmem:[#allocation9 + $0x28] sm:$0xff]  ;;  %v2433_v16 = vpack.c.bf16 %v696_v10, %v695_v9  ;;  %v697_v17 = vld [vmem:[#allocation11 + $0x30] sm:$0xff]  ;;  %v698_v18 = vld [vmem:[#allocation11 + $0x38] sm:$0xff]  ;;  %vm1739_vm7 = vcmask 1048320   ;;  %s3706_s6 = sld [smem:[#allocation25_spill]]  ;;  %s581_s29 = scalar_lea.vmem [#allocation15], %s3403_s14 }
  0xf2   : > { %2394 = vmatprep.subr.bf16.mxu0 %v2393_v8  ;;  %2430 = vmatprep.subr.bf16.mxu1 %v2429_v7  ;;  %v2401_v19 = vpack.c.bf16 %v598_v15, %v597_v14  ;;  %v599_v20 = vld [vmem:[#allocation9 + $0x30] sm:$0xff]  ;;  %v600_v21 = vld [vmem:[#allocation9 + $0x38] sm:$0xff]  ;;  %v2437_v22 = vpack.c.bf16 %v698_v18, %v697_v17  ;;  %v699_v24 = vld [vmem:[#allocation11 + $0x40] sm:$0xff]  ;;  %s2087_s20 = sshll.u32 %s583_s7, 2  ;;  %s3707_s15 = sld [smem:[#allocation33_spill]] }
  0xf3   : > { %2396 = vmatpush3.bf16.msra.mxu0 %v2393_v8  ;;  %v589_v23 = vld [vmem:[%s501_s12] sm:$0xff]  ;;  %v700_v25 = vld [vmem:[#allocation11 + $0x48] sm:$0xff]  ;;  %v2405_v26 = vpack.c.bf16 %v600_v21, %v599_v20  ;;  %v702_v32 = vld [vmem:[#allocation11 + $0x58] sm:$0xff]  ;;  %s2088_s21 = sshll.u32 %s3112_s25, 8  ;;  %s1845_s14 = scalar_lea.sflag [#allocation5], %s3400_s11 }
  0xf4   : > { %2398 = vmatprep.subr.bf16.mxu0 %v2397_v13  ;;  %2264 = vmatprep.mubr.f32.mxu1 %v589_v23  ;;  %v601_v27 = vld [vmem:[#allocation9 + $0x40] sm:$0xff]  ;;  %v602_v28 = vld [vmem:[#allocation9 + $0x48] sm:$0xff]  ;;  %v2441_v30 = vpack.c.bf16 %v700_v25, %v699_v24  ;;  %v701_v31 = vld [vmem:[#allocation11 + $0x50] sm:$0xff]  ;;  %s586_s16 = scalar_lea.vmem %s3704_s17, %s2087_s20  ;;  %s3023_s25 = smov [#allocation15]  }
  0xf5   : > { %2432 = vmatpush3.bf16.msra.mxu1 %v2429_v7  ;;  %v587_v29 = vld [vmem:[%s492_s19] sm:$0xff]  ;;  %v2409_v33 = vpack.c.bf16 %v602_v28, %v601_v27  ;;  %v604_v35 = vld [vmem:[#allocation9 + $0x58] sm:$0xff]  ;;  %v2445_v36 = vpack.c.bf16 %v702_v32, %v701_v31  ;;  %v704_v38 = vld [vmem:[#allocation11 + $0x68] sm:$0xff]  ;;  %s2934_s28 = sshll.u32 %s3023_s25, 4  ;;  %s2935_s28 = int_to_ptr.vmem [resolvable:$false] %s2934_s28 }
  0xf6   : > { %2434 = vmatprep.subr.bf16.mxu1 %v2433_v16  ;;  %2229 = vmatprep.mubr.f32.mxu0 %v587_v29  ;;  %v603_v34 = vld [vmem:[#allocation9 + $0x50] sm:$0xff]  ;;  %v703_v37 = vld [vmem:[#allocation11 + $0x60] sm:$0xff]  ;;  %v606_v41 = vld [vmem:[#allocation9 + $0x68] sm:$0xff]  ;;  %s2936_s3 = scalar_lea.vmem %s2935_s28, 512 }
  0xf7   : > { %2400 = vmatpush3.bf16.msra.mxu0 %v2397_v13  ;;  %v2413_v39 = vpack.c.bf16 %v604_v35, %v603_v34  ;;  %v605_v40 = vld [vmem:[#allocation9 + $0x60] sm:$0xff]  ;;  %v2449_v42 = vpack.c.bf16 %v704_v38, %v703_v37  ;;  %v705_v43 = vld [vmem:[#allocation11 + $0x70] sm:$0xff]  ;;  %v706_v44 = vld [vmem:[#allocation11 + $0x78] sm:$0xff]  ;;  %v3020_v34 = vmov 0.0   ;;  %p3709_p4 = scmp.ne.s32.totalorder %s3706_s6, 0 }
  0xf8   : > { %2402 = vmatprep.subr.bf16.mxu0 %v2401_v19  ;;  %v2417_v45 = vpack.c.bf16 %v606_v41, %v605_v40  ;;  %v607_v46 = vld [vmem:[#allocation9 + $0x70] sm:$0xff]  ;;  %v608_v47 = vld [vmem:[#allocation9 + $0x78] sm:$0xff]  ;;  %v2453_v48 = vpack.c.bf16 %v706_v44, %v705_v43  ;;  %v789_v52 = vld [vmem:[#allocation12] sm:$0xff] }
  0xf9   : > { %2436 = vmatpush3.bf16.msra.mxu1 %v2433_v16  ;;  %v2421_v49 = vpack.c.bf16 %v608_v47, %v607_v46  ;;  %v590_v50 = vld [vmem:[%s501_s12 + $0x8] sm:$0xff]  ;;  %v791_v54 = vld [vmem:[#allocation12 + $0x10] sm:$0xff]  ;;  %v793_v58 = vld [vmem:[#allocation12 + $0x20] sm:$0xff]  ;;  %s1858_s12 = sshll.u32 %s581_s29, 4  ;;  %s3575_s12 = int_to_ptr.vmem [resolvable:$true] %s1858_s12 }
  0xfa   : > { %2438 = vmatprep.subr.bf16.mxu1 %v2437_v22  ;;  %v588_v51 = vld [vmem:[%s492_s19 + $0x8] sm:$0xff]  ;;  %v591_v61 = vld [vmem:[%s510_s26] sm:$0xff]  ;;  %vm3444_vm1 = vmpackc.low %vm897_vm0, %vm897_vm0  ;;  %s3022_s19 = smov 32   ;;  %s2930_s20 = scalar_lea.vmem %s3575_s12, 256 }
  0xfb   : > { %2404 = vmatpush3.bf16.msra.mxu0 %v2401_v19  ;;  %v790_v53 = vld [vmem:[#allocation12 + $0x8] sm:$0xff]  ;;  %v792_v56 = vld [vmem:[#allocation12 + $0x18] sm:$0xff]  ;;  %v795_v62 = vld [vmem:[#allocation12 + $0x30] sm:$0xff]  ;;  %p2931_p2 = scmp.ne.s32.totalorder %s3575_s12, %s2930_s20  ;;  %p2937_p7 = scmp.lt.s32.totalorder %s3575_s12, %s2935_s28 }
  0xfc   : > { %2406 = vmatprep.subr.bf16.mxu0 %v2405_v26  ;;  %v2457_v55 = vpack.c.bf16 %v790_v53, %v789_v52  ;;  %v2461_v57 = vpack.c.bf16 %v792_v56, %v791_v54  ;;  %v794_v59 = vld [vmem:[#allocation12 + $0x28] sm:$0xff]  ;;  %v796_v63 = vld [vmem:[#allocation12 + $0x38] sm:$0xff]  ;;  %v2052_v0 = vld [vmem:[%s3632_s8] ss:$0 sm:$0xff]  ;;  %p2938_p9 = scmp.lt.s32.totalorder %s2936_s3, %s2930_s20 }
  0xfd   : > { %2440 = vmatpush3.bf16.msra.mxu1 %v2437_v22  ;;  %v2465_v60 = vpack.c.bf16 %v794_v59, %v793_v58  ;;  %v2051_v2 = vld [vmem:[%s3701_s24] ss:$0 sm:$0xff]  ;;  %v2469_v3 = vpack.c.bf16 %v796_v63, %v795_v62  ;;  %v797_v4 = vld [vmem:[#allocation12 + $0x40] sm:$0xff]  ;;  %v798_v5 = vld [vmem:[#allocation12 + $0x48] sm:$0xff]  ;;  %p2932_p11 = pnand %p2931_p2, %p3709_p4 }
  0xfe   : > { %2442 = vmatprep.subr.bf16.mxu1 %v2441_v30  ;;  %v2473_v13 = vpack.c.bf16 %v798_v5, %v797_v4  ;;  %v799_v16 = vld [vmem:[#allocation12 + $0x50] sm:$0xff]  ;;  %v800_v17 = vld [vmem:[#allocation12 + $0x58] sm:$0xff]  ;;  %v801_v19 = vld [vmem:[#allocation12 + $0x60] sm:$0xff]  ;;  %p2939_p12 = por %p2938_p9, %p2937_p7 }
  0xff   : > { %2408 = vmatpush3.bf16.msra.mxu0 %v2405_v26  ;;  %v2477_v18 = vpack.c.bf16 %v800_v17, %v799_v16  ;;  %v802_v20 = vld [vmem:[#allocation12 + $0x68] sm:$0xff]  ;;  %v803_v23 = vld [vmem:[#allocation12 + $0x70] sm:$0xff]  ;;  %v804_v24 = vld [vmem:[#allocation12 + $0x78] sm:$0xff]  ;;  %p2933_p13 = pneg %p2932_p11 }
 0x100   : > { %2410 = vmatprep.subr.bf16.mxu0 %v2409_v33  ;;  %v2481_v22 = vpack.c.bf16 %v802_v20, %v801_v19  ;;  %v2485_v25 = vpack.c.bf16 %v804_v24, %v803_v23  ;;  %v592_v26 = vld [vmem:[%s510_s26 + $0x8] sm:$0xff]  ;;  %v2090_v27 = vld [vmem:[%s586_s16] sm:$0xf]  }
 0x101   : > { %2444 = vmatpush3.bf16.msra.mxu1 %v2441_v30  ;;  %v2091_v28 = vunpack.c.0.s8 %v2090_v27  ;;  %v2092_v29 = vunpack.c.1.s8 %v2090_v27  ;;  %v2053_v44 = vld [vmem:[%s3705_s18] ss:$0 sm:$0xff]  ;;  %p2940_p8 = pnand %p2939_p12, %p2933_p13 }
 0x102   : > { %2446 = vmatprep.subr.bf16.mxu1 %v2445_v36 }
 0x103   : > { %2412 = vmatpush3.bf16.msra.mxu0 %v2409_v33  ;;  %v891_v30 = vcvt.s32.f32 %v2091_v28  ;;  %v892_v31 = vcvt.s32.f32 %v2092_v29 }
 0x104   : > { %2414 = vmatprep.subr.bf16.mxu0 %v2413_v39 }
 0x105   : > { %2448 = vmatpush3.bf16.msra.mxu1 %v2445_v36  ;;  %vm893_vm2 = vcmp.eq.f32.partialorder %v891_v30, 0.0  ;;  %vm894_vm3 = vcmp.eq.f32.partialorder %v892_v31, 0.0 }
 0x106   : > { %2450 = vmatprep.subr.bf16.mxu1 %v2449_v42  ;;  %v3471_v35 = vsel %vm893_vm2, -1e+09, %v3020_v34  ;;  %v3473_v38 = vsel %vm894_vm3, -1e+09, %v3020_v34 }
 0x107   : > { %2416 = vmatpush3.bf16.msra.mxu0 %v2413_v39 }
 0x108   : > { %2418 = vmatprep.subr.bf16.mxu0 %v2417_v45 }
 0x109   : > { %2452 = vmatpush3.bf16.msra.mxu1 %v2449_v42 }
 0x10a   : > { %2454 = vmatprep.subr.bf16.mxu1 %v2453_v48 }
 0x10b   : > { %2420 = vmatpush3.bf16.msra.mxu0 %v2417_v45 }
 0x10c   : > { %2422 = vmatprep.subr.bf16.mxu0 %v2421_v49 }
 0x10d   : > { %2456 = vmatpush3.bf16.msra.mxu1 %v2453_v48 }
 0x10f   : > { %2424 = vmatpush3.bf16.msra.mxu0 %v2421_v49 }
 0x110   : > { %2265 = vmatmul.mubr.f32.vlgmr.msra.gmra.mrb[0].mxu1 %v590_v50  ;;  %2458 = vmatprep.subr.bf16.mxu0 %v2457_v55 }
 0x112   : > { %2230 = vmatmul.mubr.f32.vlgmr.msra.gmra.mrb[0].mxu0 %v588_v51 }
 0x113   : > { %2460 = vmatpush3.bf16.msra.mxu0 %v2457_v55  ;;  %2299 = vmatprep.mubr.f32.mxu0 %v591_v61 }
 0x114   : > { %2462 = vmatprep.subr.bf16.mxu0 %v2461_v57 }
 0x117   : > { %2464 = vmatpush3.bf16.msra.mxu0 %v2461_v57 }
 0x118   : > { %2466 = vmatprep.subr.bf16.mxu0 %v2465_v60 }
 0x11b   : > { %2468 = vmatpush3.bf16.msra.mxu0 %v2465_v60 }
 0x11c   : > { %2470 = vmatprep.subr.bf16.mxu0 %v2469_v3 }
 0x11f   : > { %2472 = vmatpush3.bf16.msra.mxu0 %v2469_v3 }
 0x120   : > { %2474 = vmatprep.subr.bf16.mxu0 %v2473_v13 }
 0x123   : > { %2476 = vmatpush3.bf16.msra.mxu0 %v2473_v13 }
 0x124   : > { %2478 = vmatprep.subr.bf16.mxu0 %v2477_v18 }
 0x127   : > { %2480 = vmatpush3.bf16.msra.mxu0 %v2477_v18 }
 0x128   : > { %2482 = vmatprep.subr.bf16.mxu0 %v2481_v22 }
 0x12b   : > { %2484 = vmatpush3.bf16.msra.mxu0 %v2481_v22 }
 0x12c   : > { %2486 = vmatprep.subr.bf16.mxu0 %v2485_v25 }
 0x12f   : > { %2488 = vmatpush3.bf16.msra.mxu0 %v2485_v25 }
 0x132   : > { %2300 = vmatmul.mubr.f32.vlgmr.msra.gmra.mrb[2].mxu0 %v592_v26 }
 0x1e3   : > { %v2266_v1 = vpop.f32.mrb[0].mxu1 }
 0x1e4   : > { %v786_v6 = vadd.f32 %v2266_v1, %v2052_v0  ;;  %v780_v7 = vpop.f32.mrb[1].mxu1 }
 0x1e5   : > { %v2231_v8 = vpop.f32.mrb[0].mxu0  ;;  %v781_v9 = vadd.f32 %v2052_v0, %v780_v7 }
 0x1e6   : > { %v682_v10 = vpop.f32.mrb[1].mxu0  ;;  %v3460_v21 = vadd.f32 %v2231_v8, %v2051_v2 }
 0x1e7   : > { %v3448_v12 = vadd.f32 %v2051_v2, %v682_v10  ;;  %v2489_v14 = vpack.c.bf16 %v786_v6, %v781_v9  ;;  %v3450_v15 = vpack.i.bf16 %v786_v6, %v781_v9 }
 0x1e9   : > { %1095 = vrot.lane.b32.xlu1 %v3448_v12, %s3019_s4  ;;  %2306 = vmatprep.mubr.msk.f32.mxu1 %vm897_vm0, %v3448_v12 }
 0x1ea   : > { %2491 = vmatprep.subr.msk.bf16.mxu1 %vm3444_vm1, %v2489_v14 }
 0x1eb   : > { %2494 = vmatpush3.bf16.xpose.msk.msra.mxu1 %vm3444_vm1, %v2489_v14 }
 0x1f2   : > { %2307 = vmatmul.mubr.msk.f32.vlgmr.msra.gmra.mrb[2].mxu1 %vm897_vm0, %v3460_v21 }
 0x205   : > { %v2301_v43 = vpop.f32.mrb[2].mxu0 }
 0x206   : > { %v878_v45 = vpop.f32.mrb[3].mxu0  ;;  %v884_v46 = vadd.f32 %v2301_v43, %v2053_v44 }
 0x207   : > { %v879_v47 = vadd.f32 %v2053_v44, %v878_v45 }
 0x209   : > { %v2495_v48 = vpack.c.bf16 %v884_v46, %v879_v47  ;;  %v3502_v20 = vpack.i.bf16 %v884_v46, %v879_v47 }
 0x20b   : > { %2496 = vmatprep.subr.bf16.mxu1 %v2495_v48 }
 0x20c   : > { %2498 = vmatpush3.bf16.msra.mxu1 %v2495_v48 }
 0x25b   : > { %v1096_v63 = vpop.permute.xlu1 %1095 }
 0x2c5   : > { %v2308_v32 = vpop.f32.mrb[2].mxu1 }
 0x2c6   : > { %v976_v33 = vpop.f32.mrb[3].mxu1  ;;  %v986_v36 = vmul.f32 0.17677669, %v2308_v32 }
 0x2c7   : > { %v985_v37 = vmul.f32 0.17677669, %v976_v33 }
 0x2c8   : > { %v988_v41 = vadd.f32 %v986_v36, %v3473_v38 }
 0x2c9   : > { %v987_v39 = vadd.f32 %v985_v37, %v3471_v35 }
 0x2ca   : > { %v993_v42 = vsel %vm989_vm4, %v988_v41, -inf }
 0x2cb   : > { %v990_v40 = vsel %vm989_vm4, %v987_v39, -inf }
 0x2cc   : > { %991 = vmax.xlane.f32.xlu0 %v990_v40 }
 0x2d0   : > { %994 = vmax.xlane.f32.xlu0 %v993_v42 }
 0x2e6   : > { %2667 = vrot.lane.b32.xlu0 %v3450_v15, %s3019_s4 }
 0x359   : > { %v992_v49 = vpop.xlane.xlu0 %991 }
 0x35a   : > { %v996_v50 = vsub.f32 %v987_v39, %v992_v49 }
 0x35c   : > { %v998_v53 = vmul.f32 1.442695, %v996_v50 }
 0x35d   : > { %v995_v51 = vpop.xlane.xlu0 %994 }
 0x35e   : > { %v997_v52 = vsub.f32 %v988_v41, %v995_v51 }
 0x360   : > { %v1000_v54 = vmul.f32 1.442695, %v997_v52 }
 0x361   : > { %v2668_v55 = vpop.permute.xlu0 %2667 }
 0x362   : > { %2696 = vpow2.f32 %v1000_v54  ;;  %v2670_v56 = vunpack.i.h.bf16 %v2668_v55  ;;  %v2669_v57 = vunpack.i.l.bf16 %v2668_v55 }
 0x363   : > { %2698 = vpow2.f32 %v998_v53 }
 0x364   : > { %v2499_v58 = vpack.c.bf16 %v2670_v56, %v2669_v57 }
 0x366   : > { %2501 = vmatprep.subr.msk.bf16.mxu1 %vm3444_vm1, %v2499_v58 }
 0x36c   : > { %v2697_v59 = vpop.eup %2696 }
 0x36d   : > { %v1005_v60 = vsel %vm989_vm4, %v2697_v59, 0.0  ;;  %v2699_v61 = vpop.eup %2698 }
 0x36e   : > { %1006 = vadd.xlane.f32.xlu1 %v1005_v60  ;;  %v1002_v62 = vsel %vm989_vm4, %v2699_v61, 0.0 }
 0x372   : > { %1003 = vadd.xlane.f32.xlu1 %v1002_v62 }
 0x383   : > { %1097 = vrot.lane.b32.xlu1 %v3460_v21, %s3019_s4 }
 0x3fb   : > { %v1007_v0 = vpop.xlane.xlu1 %1006 }
 0x3fc   : > { %2700 = vrcp.f32 %v1007_v0 }
 0x3ff   : > { %v1004_v1 = vpop.xlane.xlu1 %1003 }
 0x400   : > { %2702 = vrcp.f32 %v1004_v1 }
 0x403   : > { %v1098_v6 = vpop.permute.xlu1 %1097 }
 0x406   : > { %v2701_v2 = vpop.eup %2700 }
 0x407   : > { %v1011_v5 = vmul.f32 %v2701_v2, %v2697_v59 }
 0x40a   : > { %v2703_v3 = vpop.eup %2702 }
 0x40b   : > { %v1009_v4 = vmul.f32 %v2703_v3, %v2699_v61 }
 0x40d   : > { %2313 = vmatprep.mubr.msk.f32.mxu1 %vm989_vm4, %v1009_v4 }
 0x40e   : > { %2314 = vmatmul.mubr.msk.f32.vlgmr.msra.gmra.mrb[4].mxu1 %vm989_vm4, %v1011_v5 }
 0x40f   : > { %2504 = vmatpush3.bf16.xpose.msk.msra.mxu1 %vm3444_vm1, %v2499_v58  ;;  %2320 = vmatprep.mubr.msk.f32.mxu1 %vm897_vm0, %v1096_v63 }
 0x416   : > { %2321 = vmatmul.mubr.msk.f32.vlgmr.msra.gmra.mrb[6].mxu1 %vm897_vm0, %v1098_v6 }
 0x4e1   : > { %v2315_v7 = vpop.f32.mrb[4].mxu1 }
 0x4e2   : > { %1094 = vst.msk [vmem:[#allocation2 + $0x8] sm:$0xff] %vm897_vm0, %v2315_v7  ;;  %v1084_v8 = vpop.f32.mrb[5].mxu1 }
 0x4e3   : > { %1093 = vst.msk [vmem:[#allocation2] sm:$0xff] %vm897_vm0, %v1084_v8 }
 0x4e9   : > { %v2322_v9 = vpop.f32.mrb[6].mxu1 }
 0x4ea   : > { %v1187_v10 = vmul.f32 0.17677669, %v2322_v9  ;;  %v1177_v13 = vpop.f32.mrb[7].mxu1 }
 0x4eb   : > { %v1186_v14 = vmul.f32 0.17677669, %v1177_v13 }
 0x4ec   : > { %v1189_v16 = vadd.f32 %v1187_v10, %v3473_v38 }
 0x4ed   : > { %v1188_v17 = vadd.f32 %v1186_v14, %v3471_v35 }
 0x4ee   : > { %v1193_v18 = vsel %vm989_vm4, %v1189_v16, -inf }
 0x4ef   : > { %1194 = vmax.xlane.f32.xlu0 %v1193_v18  ;;  %v1190_v19 = vsel %vm989_vm4, %v1188_v17, -inf }
 0x4f0   : > { %1191 = vmax.xlane.f32.xlu1 %v1190_v19 }
 0x501   : > { %2672 = vrot.lane.b32.xlu1 %v3502_v20, %s3019_s4 }
 0x505   : > { %1312 = vrot.lane.b32.xlu1 %v3448_v12, %s3021_s13 }
 0x509   : > { %1314 = vrot.lane.b32.xlu1 %v3460_v21, %s3021_s13 }
 0x57c   : > { %v1195_v22 = vpop.xlane.xlu0 %1194 }
 0x57d   : > { %v1197_v23 = vsub.f32 %v1189_v16, %v1195_v22  ;;  %v1192_v24 = vpop.xlane.xlu1 %1191 }
 0x57e   : > { %v1196_v25 = vsub.f32 %v1188_v17, %v1192_v24 }
 0x57f   : > { %v1200_v26 = vmul.f32 1.442695, %v1197_v23 }
 0x580   : > { %v1198_v27 = vmul.f32 1.442695, %v1196_v25 }
 0x581   : > { %2704 = vpow2.f32 %v1200_v26  ;;  %v2673_v28 = vpop.permute.xlu1 %2672 }
 0x582   : > { %v2675_v29 = vunpack.i.h.bf16 %v2673_v28  ;;  %v2674_v30 = vunpack.i.l.bf16 %v2673_v28  ;;  %2706 = vpow2.f32 %v1198_v27 }
 0x584   : > { %v2505_v31 = vpack.c.bf16 %v2675_v29, %v2674_v30 }
 0x585   : > { %v1313_v48 = vpop.permute.xlu1 %1312 }
 0x586   : > { %2506 = vmatprep.subr.bf16.mxu1 %v2505_v31 }
 0x587   : > { %2508 = vmatpush3.bf16.msra.mxu1 %v2505_v31 }
 0x589   : > { %v1315_v49 = vpop.permute.xlu1 %1314 }
 0x58b   : > { %v2705_v32 = vpop.eup %2704 }
 0x58c   : > { %v1205_v33 = vsel %vm989_vm4, %v2705_v32, 0.0  ;;  %v2707_v34 = vpop.eup %2706 }
 0x58d   : > { %1206 = vadd.xlane.f32.xlu0 %v1205_v33  ;;  %v1202_v36 = vsel %vm989_vm4, %v2707_v34, 0.0 }
 0x591   : > { %1203 = vadd.xlane.f32.xlu0 %v1202_v36 }
 0x5a7   : > { %2677 = vrot.lane.b32.xlu0 %v3450_v15, %s3021_s13 }
 0x61a   : > { %v1207_v37 = vpop.xlane.xlu0 %1206 }
 0x61b   : > { %2708 = vrcp.f32 %v1207_v37 }
 0x61e   : > { %v1204_v39 = vpop.xlane.xlu0 %1203 }
 0x61f   : > { %2710 = vrcp.f32 %v1204_v39 }
 0x622   : > { %v2678_v40 = vpop.permute.xlu0 %2677 }
 0x623   : > { %v2680_v41 = vunpack.i.h.bf16 %v2678_v40  ;;  %v2679_v42 = vunpack.i.l.bf16 %v2678_v40 }
 0x625   : > { %v2509_v43 = vpack.c.bf16 %v2680_v41, %v2679_v42  ;;  %v2709_v44 = vpop.eup %2708 }
 0x626   : > { %v1211_v47 = vmul.f32 %v2709_v44, %v2705_v32 }
 0x627   : > { %2511 = vmatprep.subr.msk.bf16.mxu1 %vm3444_vm1, %v2509_v43 }
 0x629   : > { %v2711_v45 = vpop.eup %2710 }
 0x62a   : > { %v1209_v46 = vmul.f32 %v2711_v45, %v2707_v34 }
 0x62c   : > { %2327 = vmatprep.mubr.msk.f32.mxu1 %vm989_vm4, %v1209_v46 }
 0x62d   : > { %2328 = vmatmul.mubr.msk.f32.vlgmr.msra.gmra.mrb[8].mxu1 %vm989_vm4, %v1211_v47 }
 0x62e   : > { %2514 = vmatpush3.bf16.xpose.msk.msra.mxu1 %vm3444_vm1, %v2509_v43  ;;  %2334 = vmatprep.mubr.msk.f32.mxu1 %vm897_vm0, %v1313_v48 }
 0x635   : > { %2335 = vmatmul.mubr.msk.f32.vlgmr.msra.gmra.mrb[10].mxu1 %vm897_vm0, %v1315_v49 }
 0x700   : > { %v3522_v50 = vpop.f32.mrb[8].mxu1 }
 0x701   : > { %v3524_v51 = vpop.f32.mrb[9].mxu1 }
 0x708   : > { %v2336_v52 = vpop.f32.mrb[10].mxu1 }
 0x709   : > { %v1404_v53 = vmul.f32 0.17677669, %v2336_v52  ;;  %v1394_v54 = vpop.f32.mrb[11].mxu1 }
 0x70a   : > { %v1403_v55 = vmul.f32 0.17677669, %v1394_v54 }
 0x70b   : > { %v1406_v56 = vadd.f32 %v1404_v53, %v3473_v38 }
 0x70c   : > { %v1405_v57 = vadd.f32 %v1403_v55, %v3471_v35 }
 0x70d   : > { %v1410_v58 = vsel %vm989_vm4, %v1406_v56, -inf }
 0x70e   : > { %1411 = vmax.xlane.f32.xlu0 %v1410_v58  ;;  %v1407_v59 = vsel %vm989_vm4, %v1405_v57, -inf  ;;  %v1745_v58 = vld [vmem:[#allocation14 + $0x8] sm:$0xff] }
 0x70f   : > { %1408 = vmax.xlane.f32.xlu1 %v1407_v59 }
 0x720   : > { %2682 = vrot.lane.b32.xlu1 %v3502_v20, %s3021_s13 }
 0x724   : > { %1527 = vrot.lane.b32.xlu1 %v3448_v12, %s3022_s19 }
 0x728   : > { %1529 = vrot.lane.b32.xlu1 %v3460_v21, %s3022_s19 }
 0x79b   : > { %v1412_v60 = vpop.xlane.xlu0 %1411 }
 0x79c   : > { %v1414_v61 = vsub.f32 %v1406_v56, %v1412_v60  ;;  %v1409_v62 = vpop.xlane.xlu1 %1408  ;;  %v1747_v60 = vld [vmem:[#allocation14 + $0x18] sm:$0xff] }
 0x79d   : > { %v1413_v63 = vsub.f32 %v1405_v57, %v1409_v62  ;;  %v1744_v57 = vld [vmem:[#allocation14] sm:$0xff] }
 0x79e   : > { %v1417_v0 = vmul.f32 1.442695, %v1414_v61  ;;  %v2529_v59 = vpack.c.bf16 %v1745_v58, %v1744_v57  ;;  %v1748_v62 = vld [vmem:[#allocation14 + $0x20] sm:$0xff] }
 0x79f   : > { %v1415_v1 = vmul.f32 1.442695, %v1413_v63  ;;  %v1749_v63 = vld [vmem:[#allocation14 + $0x28] sm:$0xff] }
 0x7a0   : > { %2712 = vpow2.f32 %v1417_v0  ;;  %v2683_v2 = vpop.permute.xlu1 %2682  ;;  %2530 = vmatprep.subr.bf16.mxu0 %v2529_v59  ;;  %v2537_v0 = vpack.c.bf16 %v1749_v63, %v1748_v62 }
 0x7a1   : > { %v2685_v3 = vunpack.i.h.bf16 %v2683_v2  ;;  %v2684_v4 = vunpack.i.l.bf16 %v2683_v2  ;;  %2714 = vpow2.f32 %v1415_v1  ;;  %2532 = vmatpush3.bf16.msra.mxu0 %v2529_v59  ;;  %v1750_v1 = vld [vmem:[#allocation14 + $0x30] sm:$0xff]  ;;  %v1751_v2 = vld [vmem:[#allocation14 + $0x38] sm:$0xff] }
 0x7a3   : > { %v2515_v5 = vpack.c.bf16 %v2685_v3, %v2684_v4  ;;  %v2541_v3 = vpack.c.bf16 %v1751_v2, %v1750_v1  ;;  %v1752_v4 = vld [vmem:[#allocation14 + $0x40] sm:$0xff] }
 0x7a4   : > { %v1528_v23 = vpop.permute.xlu1 %1527 }
 0x7a5   : > { %2516 = vmatprep.subr.bf16.mxu1 %v2515_v5 }
 0x7a6   : > { %2518 = vmatpush3.bf16.msra.mxu1 %v2515_v5  ;;  %v1753_v5 = vld [vmem:[#allocation14 + $0x48] sm:$0xff] }
 0x7aa   : > { %v2713_v6 = vpop.eup %2712 }
 0x7ab   : > { %v1422_v12 = vsel %vm989_vm4, %v2713_v6, 0.0  ;;  %v2715_v7 = vpop.eup %2714 }
 0x7ac   : > { %1423 = vadd.xlane.f32.xlu0 %v1422_v12  ;;  %v1419_v21 = vsel %vm989_vm4, %v2715_v7, 0.0  ;;  %v1754_v12 = vld [vmem:[#allocation14 + $0x50] sm:$0xff] }
 0x7b0   : > { %1420 = vadd.xlane.f32.xlu0 %v1419_v21 }
 0x7c6   : > { %2687 = vrot.lane.b32.xlu0 %v3450_v15, %s3022_s19  ;;  %v1530_v15 = vpop.permute.xlu1 %1529 }
 0x839   : > { %v1424_v8 = vpop.xlane.xlu0 %1423 }
 0x83a   : > { %2716 = vrcp.f32 %v1424_v8  ;;  %v1756_v8 = vld [vmem:[#allocation14 + $0x60] sm:$0xff] }
 0x83d   : > { %v1421_v9 = vpop.xlane.xlu0 %1420 }
 0x83e   : > { %2718 = vrcp.f32 %v1421_v9  ;;  %v1757_v9 = vld [vmem:[#allocation14 + $0x68] sm:$0xff] }
 0x841   : > { %v2688_v10 = vpop.permute.xlu0 %2687 }
 0x842   : > { %v2690_v13 = vunpack.i.h.bf16 %v2688_v10  ;;  %v2689_v14 = vunpack.i.l.bf16 %v2688_v10  ;;  %v2553_v10 = vpack.c.bf16 %v1757_v9, %v1756_v8 }
 0x844   : > { %v2519_v16 = vpack.c.bf16 %v2690_v13, %v2689_v14  ;;  %v2717_v17 = vpop.eup %2716  ;;  %v1758_v13 = vld [vmem:[#allocation14 + $0x70] sm:$0xff]  ;;  %v1759_v14 = vld [vmem:[#allocation14 + $0x78] sm:$0xff] }
 0x845   : > { %v1428_v22 = vmul.f32 %v2717_v17, %v2713_v6  ;;  %v2545_v6 = vpack.c.bf16 %v1753_v5, %v1752_v4 }
 0x846   : > { %2521 = vmatprep.subr.msk.bf16.mxu1 %vm3444_vm1, %v2519_v16 }
 0x848   : > { %v2719_v18 = vpop.eup %2718 }
 0x849   : > { %v1426_v19 = vmul.f32 %v2719_v18, %v2715_v7  ;;  %v1755_v7 = vld [vmem:[#allocation14 + $0x58] sm:$0xff] }
 0x84a   : > { %v2549_v21 = vpack.c.bf16 %v1755_v7, %v1754_v12 }
 0x84b   : > { %2341 = vmatprep.mubr.msk.f32.mxu1 %vm989_vm4, %v1426_v19 }
 0x84c   : > { %2342 = vmatmul.mubr.msk.f32.vlgmr.msra.gmra.mrb[12].mxu1 %vm989_vm4, %v1428_v22 }
 0x84d   : > { %2524 = vmatpush3.bf16.xpose.msk.msra.mxu1 %vm3444_vm1, %v2519_v16  ;;  %2348 = vmatprep.mubr.msk.f32.mxu1 %vm897_vm0, %v1528_v23  ;;  %v2557_v16 = vpack.c.bf16 %v1759_v14, %v1758_v13 }
 0x854   : > { %2349 = vmatmul.mubr.msk.f32.vlgmr.msra.gmra.mrb[14].mxu1 %vm897_vm0, %v1530_v15 }
 0x91f   : > { %v2343_v24 = vpop.f32.mrb[12].mxu1 }
 0x920   : > { %v1507_v25 = vpop.f32.mrb[13].mxu1 }
 0x927   : > { %v2350_v26 = vpop.f32.mrb[14].mxu1 }
 0x928   : > { %v1619_v27 = vmul.f32 0.17677669, %v2350_v26  ;;  %v1609_v28 = vpop.f32.mrb[15].mxu1 }
 0x929   : > { %v1618_v29 = vmul.f32 0.17677669, %v1609_v28 }
 0x92a   : > { %v1621_v30 = vadd.f32 %v1619_v27, %v3473_v38 }
 0x92b   : > { %v1620_v31 = vadd.f32 %v1618_v29, %v3471_v35 }
 0x92c   : > { %v1625_v32 = vsel %vm989_vm4, %v1621_v30, -inf }
 0x92d   : > { %1626 = vmax.xlane.f32.xlu0 %v1625_v32  ;;  %v1622_v11 = vsel %vm989_vm4, %v1620_v31, -inf }
 0x92e   : > { %1623 = vmax.xlane.f32.xlu1 %v1622_v11 }
 0x93f   : > { %2692 = vrot.lane.b32.xlu1 %v3502_v20, %s3022_s19 }
 0x943   : > { %1305 = vrot.lane.b32.xlu1 %v3522_v50, %s3022_s19 }
 0x947   : > { %1518 = vrot.lane.b32.xlu1 %v1507_v25, %s3021_s13 }
 0x94b   : > { %1520 = vrot.lane.b32.xlu1 %v2343_v24, %s3021_s13  ;;  %v2078_v24 = vld [vmem:[%s3707_s15] ss:$0 sm:$0xff] }
 0x9ba   : > { %v1627_v33 = vpop.xlane.xlu0 %1626 }
 0x9bb   : > { %v1629_v38 = vsub.f32 %v1621_v30, %v1627_v33  ;;  %v1624_v34 = vpop.xlane.xlu1 %1623 }
 0x9bc   : > { %v1628_v35 = vsub.f32 %v1620_v31, %v1624_v34 }
 0x9bd   : > { %v1632_v36 = vmul.f32 1.442695, %v1629_v38 }
 0x9be   : > { %v1630_v37 = vmul.f32 1.442695, %v1628_v35 }
 0x9bf   : > { %v2693_v39 = vpop.permute.xlu1 %2692 }
 0x9c0   : > { %2720 = vpow2.f32 %v1630_v37  ;;  %v2695_v40 = vunpack.i.h.bf16 %v2693_v39  ;;  %v2694_v41 = vunpack.i.l.bf16 %v2693_v39 }
 0x9c1   : > { %2722 = vpow2.f32 %v1632_v36 }
 0x9c2   : > { %v2525_v20 = vpack.c.bf16 %v2695_v40, %v2694_v41 }
 0x9c3   : > { %v1306_v42 = vpop.permute.xlu1 %1305 }
 0x9c4   : > { %1311 = vst.msk [vmem:[#allocation2 + $0x8] sm:$0xff] %vm1309_vm5, %v1306_v42  ;;  %2526 = vmatprep.subr.bf16.mxu1 %v2525_v20 }
 0x9c5   : > { %2528 = vmatpush3.bf16.msra.mxu1 %v2525_v20 }
 0x9c7   : > { %v1519_v43 = vpop.permute.xlu1 %1518 }
 0x9ca   : > { %v2721_v44 = vpop.eup %2720 }
 0x9cb   : > { %v1521_v45 = vpop.permute.xlu1 %1520  ;;  %v1634_v46 = vsel %vm989_vm4, %v2721_v44, 0.0  ;;  %v2723_v47 = vpop.eup %2722 }
 0x9cc   : > { %1526 = vst.msk [vmem:[#allocation2 + $0x8] sm:$0xff] %vm1524_vm6, %v1521_v45  ;;  %1635 = vadd.xlane.f32.xlu0 %v1634_v46  ;;  %v1637_v48 = vsel %vm989_vm4, %v2723_v47, 0.0 }
 0x9d0   : > { %1638 = vadd.xlane.f32.xlu0 %v1637_v48 }
 0x9e6   : > { %1303 = vrot.lane.b32.xlu0 %v3524_v51, %s3022_s19  ;;  %v1746_v51 = vld [vmem:[#allocation14 + $0x10] sm:$0xff] }
 0x9e7   : > { %v2533_v61 = vpack.c.bf16 %v1747_v60, %v1746_v51 }
 0x9e9   : > { %2534 = vmatprep.subr.bf16.mxu0 %v2533_v61 }
 0x9ea   : > { %2536 = vmatpush3.bf16.msra.mxu0 %v2533_v61 }
 0x9eb   : > { %2538 = vmatprep.subr.bf16.mxu0 %v2537_v0 }
 0x9ee   : > { %2540 = vmatpush3.bf16.msra.mxu0 %v2537_v0 }
 0x9ef   : > { %2542 = vmatprep.subr.bf16.mxu0 %v2541_v3 }
 0x9f2   : > { %2544 = vmatpush3.bf16.msra.mxu0 %v2541_v3 }
 0x9f3   : > { %2546 = vmatprep.subr.bf16.mxu0 %v2545_v6 }
 0x9f6   : > { %2548 = vmatpush3.bf16.msra.mxu0 %v2545_v6 }
 0x9f7   : > { %2550 = vmatprep.subr.bf16.mxu0 %v2549_v21 }
 0x9fa   : > { %2552 = vmatpush3.bf16.msra.mxu0 %v2549_v21 }
 0x9fb   : > { %2554 = vmatprep.subr.bf16.mxu0 %v2553_v10 }
 0x9fe   : > { %2556 = vmatpush3.bf16.msra.mxu0 %v2553_v10 }
 0x9ff   : > { %2558 = vmatprep.subr.bf16.mxu0 %v2557_v16 }
 0xa02   : > { %2560 = vmatpush3.bf16.msra.mxu0 %v2557_v16 }
 0xa59   : > { %v1636_v49 = vpop.xlane.xlu0 %1635 }
 0xa5a   : > { %2724 = vrcp.f32 %v1636_v49 }
 0xa5d   : > { %v1639_v50 = vpop.xlane.xlu0 %1638 }
 0xa5e   : > { %2726 = vrcp.f32 %v1639_v50 }
 0xa61   : > { %v1304_v52 = vpop.permute.xlu0 %1303 }
 0xa62   : > { %1310 = vst.msk [vmem:[#allocation2] sm:$0xff] %vm1309_vm5, %v1304_v52 }
 0xa63   : > { %1525 = vst.msk [vmem:[#allocation2] sm:$0xff] %vm1524_vm6, %v1519_v43 }
 0xa64   : > { %v2725_v53 = vpop.eup %2724 }
 0xa65   : > { %v1641_v54 = vmul.f32 %v2725_v53, %v2721_v44 }
 0xa67   : > { %2355 = vmatprep.mubr.msk.f32.mxu1 %vm989_vm4, %v1641_v54 }
 0xa68   : > { %v2727_v55 = vpop.eup %2726 }
 0xa69   : > { %v1643_v56 = vmul.f32 %v2727_v55, %v2723_v47 }
 0xa6b   : > { %2356 = vmatmul.mubr.msk.f32.vlgmr.msra.gmra.mrb[16].mxu1 %vm989_vm4, %v1643_v56 }
 0xb3e   : > { %v2357_v17 = vpop.f32.mrb[16].mxu1 }
 0xb3f   : > { %1735 = vrot.lane.b32.xlu1 %v2357_v17, %s3019_s4  ;;  %v1722_v18 = vpop.f32.mrb[17].mxu1 }
 0xb40   : > { %1733 = vrot.lane.b32.xlu0 %v1722_v18, %s3019_s4  ;;  %s3708_s4 = sld [smem:[#allocation34_spill]] }
 0xb46   : > { %s3580_s7 = scalar_lea.hbm %s3708_s4, %s2088_s21 }
 0xbb1   : > { %v1736_v19 = vpop.permute.xlu1 %1735 }
 0xbb2   : > { %1741 = vst.msk [vmem:[#allocation2 + $0x8] sm:$0xff] %vm1739_vm7, %v1736_v19  ;;  %v1734_v22 = vpop.permute.xlu0 %1733 }
 0xbb3   : > { %1740 = vst.msk [vmem:[#allocation2] sm:$0xff] %vm1739_vm7, %v1734_v22 }
 0xbb9   : > { %v1743_v15 = vld [vmem:[#allocation2 + $0x8] sm:$0xff] }
 0xbba   : > { %v1742_v23 = vld [vmem:[#allocation2] sm:$0xff] }
 0xbbb   : > { %2390 = vmatprep.mubr.f32.mxu0 %v1742_v23 }
 0xbbc   : > { %2391 = vmatmul.mubr.f32.vlgmr.msra.gmra.mrb[4].mxu0 %v1743_v15 }
 0xc8f   : > { %v2392_v25 = vpop.f32.mrb[4].mxu0 }
 0xc90   : > { %v1839_v26 = vadd.f32 %v2392_v25, %v2078_v24  ;;  %v1833_v27 = vpop.f32.mrb[5].mxu0 }
 0xc91   : > { %v1834_v28 = vadd.f32 %v2078_v24, %v1833_v27 }
 0xc92   : > { %1843 = vst [vmem:[%s581_s29 + $0x8] sm:$0xff] %v1839_v26 }
 0xc93   : > { %1842 = vst [vmem:[%s581_s29] sm:$0xff] %v1834_v28 }
 0xc94   : > { %2943 = shalt.err (!%p2940_p8)
}
 0xc95   : > { %s2944_s17 = scalar_lea.hbm %s3580_s7, 256  ;;  %s2948_s30 = scalar_lea.hbm %s3708_s4, 512 }
 0xc96   : > { %p2945_p10 = scmp.ne.s32.totalorder %s3580_s7, %s2944_s17  ;;  %p2949_p6 = scmp.lt.u32.totalorder %s3580_s7, %s3708_s4 }
 0xc97   : > { %p2950_p3 = scmp.lt.u32.totalorder %s2948_s30, %s2944_s17  ;;  %p2952_p2 = scmp.lt.u32.totalorder %s2944_s17, %s3580_s7 }
 0xc98   : > { %p2946_p0 = pnand %p2945_p10, %p3709_p4 }
 0xc99   : > { %p2951_p5 = por %p2950_p3, %p2949_p6 }
 0xc9a   : > { %p2947_p1 = pneg %p2946_p0 }
 0xc9b   : > { %p2953_p11 = por %p2952_p2, %p2951_p5 }
 0xc9d   : > { %p2954_p13 = pnand %p2953_p11, %p2947_p1 }
 0xc9f   : > { %2957 = shalt.err (!%p2954_p13)
}
 0xca0   : > { %s3024_s19 = smov 128   ;;  %s3025_s29 = smov 8  }
 0xca1   : > { %2583 = dma.vmem_to_hbm [thread:$0]  (%p3709_p4), %s3575_s12, 256, %s3580_s7, %s1845_s14, %s3024_s19, %s3024_s19, %s3025_s29  }
 0xca2 PF: > { %s3710_s26 = sld [smem:[#allocation21_spill]]  ;;  %s3711_s27 = sld [smem:[#allocation23_spill]] }
 0xca3   : > { %s3712_s15 = sld [smem:[#allocation22_spill]] }
 0xca8   : > { %s1873_s21 = sand.u32 1, %s3710_s26   ;;  %p3713_p7 = scmp.ne.s32.totalorder %s3711_s27, 0 }
 0xca9   : > { %p3714_p9 = scmp.ge.s32.totalorder %s3712_s15, 2  ;;  %s1874_s9 = scalar_lea.sflag [#allocation5], %s1873_s21 }
 0xcab   : > { %p2609_p12 = pnand %p3714_p9, %p3713_p7 }
 0xcad   : > { %2991 = dma.done.wait (!%p2609_p12), %s1874_s9, 256  }
 0xcae   : > { %2993 = vsyncadd (!%p2609_p12), %s1874_s9, 4294967040  ;;  %s3715_s24 = sld [smem:[#allocation24_spill]]  ;;  %s3716_s20 = sld [smem:[#allocation26_spill]] }
 0xcaf   : > { %s3717_s21 = smov %s3000_s22  ;;  %s3718_s22 = smov %s3004_s23 }
 0xcb4   : > { %p30_p8 = scmp.ge.s32.totalorder %s3715_s24, 4   ;;  %s3719_s23 = smov %s3716_s20 }
 0xcb6   :  { %32 = sbr.rel (!%p30_p8) target bundleno = 18 (0x12), region = 156 }
 0xcbd   :  { %1879 = vsyncpa [#allocation4], 1 }
 0xcbe   :  { %1881 = vsyncpa [#allocation4 + $0x1], 1 }
 0xcbf   :  { %1882 = vsyncpa [#allocation7], 1 }
 0xcc0   :  { %1884 = vsyncpa [#allocation7 + $0x1], 1 }
 0xcc1   :  { %1885 = vsyncpa [#allocation10], 1 }
 0xcc2   :  { %1886 = vsyncpa [#allocation13], 1 }
 0xcc3   :  { %1887 = vsyncpa [#allocation5], 1 }
 0xcc4   :  { %1889 = vsyncpa [#allocation5 + $0x1], 1 }

</bundles_post_ra>
